<compile_context>
chip_gen: v7x
topology: tpu7x:2x2x1
jax: 0.10.0
libtpu: 0.0.40
codegen_flags: <defaults>
</compile_context>

<pallas_src>
import functools

import jax
import jax.numpy as jnp
from jax import lax
from jax.experimental import pallas as pl
from jax.experimental.pallas import tpu as pltpu

LRELU_SLOPE = 0.2
BN_EPS = 1e-5
F32 = jnp.float32
BF16 = jnp.bfloat16


# ----------------------------------------------------------------------------
# VMEM budgeting
# ----------------------------------------------------------------------------
def _vmem_capacity_bytes():
    try:
        return int(pltpu.get_tpu_info().vmem_capacity_bytes)
    except Exception:
        return 64 << 20          # conservative default (v7x per-core physical)


_VMEM_CAP = _vmem_capacity_bytes()
_VMEM_LIMIT = int(min((_VMEM_CAP * 9) // 10, 112 << 20))


def _mosaic_params(dims):
    return pltpu.CompilerParams(dimension_semantics=dims,
                                vmem_limit_bytes=_VMEM_LIMIT)


def _pick_tm(mn, per_col_bytes, budget=None):
    """Lane tile: full extent whenever the VMEM budget allows (it always does for
    this net -> single grid step), else the largest multiple of 128 dividing mn
    that fits the budget."""
    if budget is None:
        budget = max(_VMEM_CAP // 4, 8 << 20)
    if mn <= 128 or mn * per_col_bytes <= budget:
        return mn
    cap = max(128, int(budget // per_col_bytes) // 128 * 128)
    t = min(cap, (mn // 128) * 128)
    while t >= 128:
        if mn % t == 0:
            return t
        t -= 128
    return mn            # no 128-divisor found; take full extent (compiler decides)


# ----------------------------------------------------------------------------
# glue: folded channel-major im2col + weight reshaping (pure data movement)
# ----------------------------------------------------------------------------
def _im2col_fold(x_cf, n, hw, kh, kw, sh, sw, ph, pw):
    """Folded channel-major im2col: (C, N*H*W) -> (KH*KW*C, N*OH*OW); rows are
    tap-major / channel-minor, lanes are batch-major / spatial-minor."""
    c = x_cf.shape[0]
    h, w = hw
    x = x_cf.reshape(c, n, h, w)
    xp = jnp.pad(x, ((0, 0), (0, 0), (ph, ph), (pw, pw)))
    oh = (h + 2 * ph - kh) // sh + 1
    ow = (w + 2 * pw - kw) // sw + 1
    taps = [xp[:, :, i:i + sh * (oh - 1) + 1:sh, j:j + sw * (ow - 1) + 1:sw]
            for i in range(kh) for j in range(kw)]
    a = jnp.concatenate(taps, axis=0).reshape(kh * kw * c, n * oh * ow)
    return a, oh, ow


def _w_to_mat_cf(w_oihw):
    co, ci, kh, kw = w_oihw.shape
    # columns ordered tap-major / channel-minor to match _im2col_fold rows
    return jnp.transpose(w_oihw, (0, 2, 3, 1)).reshape(co, kh * kw * ci)


def _conv_out_hw(h, w, kh, kw, sh, sw, ph, pw):
    return (h + 2 * ph - kh) // sh + 1, (w + 2 * pw - kw) // sw + 1


# ----------------------------------------------------------------------------
# Pallas kernels
# ----------------------------------------------------------------------------
def _conv_kernel(*refs, use_lateral, use_lrelu):
    """One (Cout, tm) output tile: W (Cout,K) @ patches (K,tm) [* lateral, lrelu]."""
    if use_lateral:
        a_ref, b_ref, lat_ref, o_ref = refs
    else:
        a_ref, b_ref, o_ref = refs
        lat_ref = None
    acc = jnp.dot(b_ref[...], a_ref[...], preferred_element_type=jnp.float32)
    if use_lateral:
        acc = acc * lat_ref[...].astype(jnp.float32)
    if use_lrelu:
        acc = jnp.where(acc >= 0.0, acc, LRELU_SLOPE * acc)
    o_ref[...] = acc.astype(o_ref.dtype)


def _bn_epilogue(y, g_ref, beta_ref, inv_m):
    """Shared BN+LeakyReLU epilogue on an f32 (co, N*OH*OW) GEMM result."""
    mean = jnp.sum(y, axis=1, keepdims=True) * inv_m
    yc = y - mean                                     # mean-shifted -> no cancellation
    var = jnp.maximum(jnp.sum(yc * yc, axis=1, keepdims=True) * inv_m, 0.0)
    scale = g_ref[...] * lax.rsqrt(var + BN_EPS)      # rsqrt -> EUP slot
    z = yc * scale + beta_ref[...]
    return jnp.where(z >= 0.0, z, LRELU_SLOPE * z)


def _conv_bn_fused_kernel(a_ref, b_ref, lat_ref, g_ref, beta_ref, o_ref, *, inv_m):
    """Whole BN stage in one grid step: conv GEMM + lateral multiply + batch stats +
    folded BatchNorm affine + LeakyReLU, everything VMEM-resident."""
    y = jnp.dot(b_ref[...], a_ref[...], preferred_element_type=jnp.float32)
    y = y * lat_ref[...].astype(jnp.float32)
    o_ref[...] = _bn_epilogue(y, g_ref, beta_ref, inv_m).astype(o_ref.dtype)


def _conv_bn_head_kernel(a_ref, b_ref, lat_ref, g_ref, beta_ref, wout_ref, sel_ref,
                         head_ref, *, inv_m, nz):
    """Last BN stage + fused final conv ("head") whose kernel covers the whole
    remaining spatial map: per-batch weighted reduction as an in-kernel epilogue."""
    y = jnp.dot(b_ref[...], a_ref[...], preferred_element_type=jnp.float32)
    y = y * lat_ref[...].astype(jnp.float32)
    z = _bn_epilogue(y, g_ref, beta_ref, inv_m)           # (co, N*M2) f32
    rows = []
    for q in range(nz):                                    # nz == 1 here
        t = z * wout_ref[q]                                # (co, N*M2)
        col = jnp.sum(t, axis=0, keepdims=True)            # (1, N*M2)
        rows.append(jnp.dot(col, sel_ref[...],
                            preferred_element_type=jnp.float32))   # (1, N)
    head_ref[...] = jnp.concatenate(rows, axis=0)          # (nz, N)


def _conv_stat_kernel(a_ref, b_ref, lat_ref, y_ref, ps_ref, pq_ref):
    """Tiled fallback: conv GEMM tile -> bf16 y + f32 per-tile partial sum/sumsq."""
    acc = jnp.dot(b_ref[...], a_ref[...], preferred_element_type=jnp.float32)
    acc = acc * lat_ref[...].astype(jnp.float32)
    y_ref[...] = acc.astype(y_ref.dtype)
    ps_ref[0] = jnp.sum(acc, axis=1, keepdims=True)
    pq_ref[0] = jnp.sum(acc * acc, axis=1, keepdims=True)


def _affine_lrelu_kernel(y_ref, scale_ref, shift_ref, o_ref):
    z = y_ref[...].astype(jnp.float32) * scale_ref[...] + shift_ref[...]
    o_ref[...] = jnp.where(z >= 0.0, z, LRELU_SLOPE * z).astype(o_ref.dtype)


def _head_kernel(x_ref, w_ref, o_ref):
    o_ref[...] = jnp.dot(x_ref[...], w_ref[...],
                         preferred_element_type=jnp.float32).astype(o_ref.dtype)


# ----------------------------------------------------------------------------
# stage drivers (folded layout: activations are (C, N*H*W))
# ----------------------------------------------------------------------------
def _conv_stage(x_cf, n, hw, w_oihw, stride, pad, lateral_cf=None,
                lrelu=True, out_dtype=BF16):
    co, ci, kh, kw = w_oihw.shape
    a, oh, ow = _im2col_fold(x_cf.astype(BF16), n, hw, kh, kw,
                             stride[0], stride[1], pad[0], pad[1])
    b = _w_to_mat_cf(w_oihw).astype(BF16)
    k, mtot = a.shape
    use_lat = lateral_cf is not None
    out_sz = jnp.dtype(out_dtype).itemsize
    # double-buffered bf16 tiles (patches + lateral + output) + f32 accumulator
    per_col = 2 * (k * 2 + (co * 2 if use_lat else 0) + co * out_sz) + co * 4
    tm = _pick_tm(mtot, per_col)

    operands = [a, b]
    in_specs = [pl.BlockSpec((k, tm), lambda i: (0, i)),
                pl.BlockSpec((co, k), lambda i: (0, 0))]
    if use_lat:
        operands.append(lateral_cf.astype(BF16))
        in_specs.append(pl.BlockSpec((co, tm), lambda i: (0, i)))

    out = pl.pallas_call(
        functools.partial(_conv_kernel, use_lateral=use_lat, use_lrelu=lrelu),
        out_shape=jax.ShapeDtypeStruct((co, mtot), out_dtype),
        grid=(mtot // tm,),
        in_specs=in_specs,
        out_specs=pl.BlockSpec((co, tm), lambda i: (0, i)),
        compiler_params=_mosaic_params(("parallel",)),
    )(*operands)
    return out, (oh, ow)


def _conv_stage_bn(x_cf, n, hw, w_oihw, stride, pad, lateral_cf, gamma, beta,
                   head_w=None):
    co, ci, kh, kw = w_oihw.shape
    a, oh, ow = _im2col_fold(x_cf.astype(BF16), n, hw, kh, kw,
                             stride[0], stride[1], pad[0], pad[1])
    b = _w_to_mat_cf(w_oihw).astype(BF16)
    k, mtot = a.shape
    lat = lateral_cf.astype(BF16)
    g = gamma.reshape(co, 1).astype(F32)
    bt = beta.reshape(co, 1).astype(F32)
    inv_m = 1.0 / float(mtot)

    # Fused-path VMEM budget: double-buffered bf16 patches / lateral / output /
    # weights PLUS the f32 GEMM result and its mean-centered copy that stay live
    # across the in-kernel stats -> affine epilogue.
    fused_bytes = (2 * (k * mtot * 2 + 2 * co * mtot * 2 + co * k * 2)
                   + 2 * co * mtot * 4)
    fused_ok = fused_bytes <= (2 * _VMEM_CAP) // 5

    if fused_ok:
        common_specs = [pl.BlockSpec((k, mtot), lambda i: (0, 0)),
                        pl.BlockSpec((co, k), lambda i: (0, 0)),
                        pl.BlockSpec((co, mtot), lambda i: (0, 0)),
                        pl.BlockSpec((co, 1), lambda i: (0, 0)),
                        pl.BlockSpec((co, 1), lambda i: (0, 0))]
        if head_w is not None:
            nz = head_w.shape[0]
            m2 = oh * ow
            assert head_w.shape[2:] == (oh, ow)
            wmat = head_w.reshape(nz, co, m2).astype(F32)
            wout = jnp.tile(wmat, (1, 1, n))                      # (nz, co, N*M2)
            sel = (jnp.arange(n * m2)[:, None] // m2
                   == jnp.arange(n)[None, :]).astype(F32)         # (N*M2, N)
            head = pl.pallas_call(
                functools.partial(_conv_bn_head_kernel, inv_m=inv_m, nz=nz),
                out_shape=jax.ShapeDtypeStruct((nz, n), F32),
                grid=(1,),
                in_specs=common_specs + [
                    pl.BlockSpec((nz, co, mtot), lambda i: (0, 0, 0)),
                    pl.BlockSpec((mtot, n), lambda i: (0, 0))],
                out_specs=pl.BlockSpec((nz, n), lambda i: (0, 0)),
                compiler_params=_mosaic_params(("arbitrary",)),
            )(a, b, lat, g, bt, wout, sel)
            return None, head, (oh, ow)

        out = pl.pallas_call(
            functools.partial(_conv_bn_fused_kernel, inv_m=inv_m),
            out_shape=jax.ShapeDtypeStruct((co, mtot), BF16),
            grid=(1,),
            in_specs=common_specs,
            out_specs=pl.BlockSpec((co, mtot), lambda i: (0, 0)),
            compiler_params=_mosaic_params(("arbitrary",)),
        )(a, b, lat, g, bt)
        return out, None, (oh, ow)

    # --- Tiled fallback for very large stages (megacore-safe, single bf16 HBM
    # pass for y): conv GEMM emits bf16 y + per-tile f32 partial sum/sumsq, stats
    # combined in JAX, tiled affine pass reads the bf16 y back.
    per_col = 2 * (k * 2 + 2 * co * 2) + 2 * co * 4
    tm = _pick_tm(mtot, per_col)
    ntiles = mtot // tm
    y, ps, pq = pl.pallas_call(
        _conv_stat_kernel,
        out_shape=(jax.ShapeDtypeStruct((co, mtot), BF16),
                   jax.ShapeDtypeStruct((ntiles, co, 1), F32),
                   jax.ShapeDtypeStruct((ntiles, co, 1), F32)),
        grid=(ntiles,),
        in_specs=[pl.BlockSpec((k, tm), lambda i: (0, i)),
                  pl.BlockSpec((co, k), lambda i: (0, 0)),
                  pl.BlockSpec((co, tm), lambda i: (0, i))],
        out_specs=(pl.BlockSpec((co, tm), lambda i: (0, i)),
                   pl.BlockSpec((1, co, 1), lambda i: (i, 0, 0)),
                   pl.BlockSpec((1, co, 1), lambda i: (i, 0, 0))),
        compiler_params=_mosaic_params(("parallel",)),
    )(a, b, lat)
    mean = jnp.sum(ps, axis=0) * inv_m                               # (co, 1)
    var = jnp.maximum(jnp.sum(pq, axis=0) * inv_m - mean * mean, 0.0)
    scale = g * lax.rsqrt(var + BN_EPS)
    shift = bt - mean * scale
    out = pl.pallas_call(
        _affine_lrelu_kernel,
        out_shape=jax.ShapeDtypeStruct((co, mtot), BF16),
        grid=(ntiles,),
        in_specs=[pl.BlockSpec((co, tm), lambda i: (0, i)),
                  pl.BlockSpec((co, 1), lambda i: (0, 0)),
                  pl.BlockSpec((co, 1), lambda i: (0, 0))],
        out_specs=pl.BlockSpec((co, tm), lambda i: (0, i)),
        compiler_params=_mosaic_params(("parallel",)),
    )(y, scale, shift)
    return out, None, (oh, ow)


def _head_stage(x_cf, n, hw, w_oihw):
    """Standalone final conv whose kernel covers the entire remaining map
    (only used when the fused epilogue path was not taken)."""
    co, ci, kh, kw = w_oihw.shape
    m2 = hw[0] * hw[1]
    xa = (x_cf.reshape(ci, n, m2).transpose(1, 0, 2)
          .reshape(n, ci * m2)).astype(BF16)
    wb = jnp.transpose(w_oihw.reshape(co, ci * m2)).astype(BF16)
    out = pl.pallas_call(
        _head_kernel,
        out_shape=jax.ShapeDtypeStruct((n, co), F32),
        grid=(1,),
        in_specs=[pl.BlockSpec((n, ci * m2), lambda i: (0, 0)),
                  pl.BlockSpec((ci * m2, co), lambda i: (0, 0))],
        out_specs=pl.BlockSpec((n, co), lambda i: (0, 0)),
        compiler_params=_mosaic_params(("arbitrary",)),
    )(xa, wb)
    return out


# ----------------------------------------------------------------------------
# full forward (netD2.forward, encoder=False path, return_hidden=False)
# ----------------------------------------------------------------------------
def netd2_forward_pallas(x_nchw, params, laterals_nchw, encoder=False):
    # NOTE: the `inputs.size(-1) == 3` transpose branch of the original forward is
    # not exercised (nc=2 inputs); it would be a plain jnp.transpose in glue.
    n, c, h, w = x_nchw.shape
    # fold batch into the lane axis: channel-major (C, N*H*W)
    x = jnp.transpose(x_nchw, (1, 0, 2, 3)).reshape(c, n * h * w).astype(BF16)
    hw = (h, w)

    def lat(i):
        L = laterals_nchw[i]
        return jnp.transpose(L, (1, 0, 2, 3)).reshape(L.shape[1], -1)

    x, hw = _conv_stage(x, n, hw, params["w1"], (2, 2), (1, 1), None, lrelu=True)
    x, hw = _conv_stage(x, n, hw, params["w3"], (2, 2), (1, 1), lat(0), lrelu=True)
    x, _, hw = _conv_stage_bn(x, n, hw, params["w5"], (2, 2), (1, 1), lat(1),
                              params["bn6_gamma"], params["bn6_beta"])
    x, hw = _conv_stage(x, n, hw, params["w8"], (2, 2), (1, 1), lat(2), lrelu=True)
    x, _, hw = _conv_stage_bn(x, n, hw, params["w10"], (2, 2), (1, 1), lat(3),
                              params["bn11_gamma"], params["bn11_beta"])

    co_out, _, kh_out, kw_out = params["w_out"].shape
    oh6, ow6 = _conv_out_hw(hw[0], hw[1], 2, 4, 2, 2, 0, 1)
    head_w = params["w_out"] if (oh6, ow6) == (kh_out, kw_out) else None
    x, head, hw = _conv_stage_bn(x, n, hw, params["w13"], (2, 2), (0, 1), lat(4),
                                 params["bn14_gamma"], params["bn14_beta"],
                                 head_w=head_w)

    if head is not None:
        out_nchw = jnp.transpose(head, (1, 0)).reshape(n, co_out, 1, 1)
    elif hw == (kh_out, kw_out):
        out_nchw = _head_stage(x, n, hw, params["w_out"]).reshape(n, co_out, 1, 1)
    else:
        y, hw2 = _conv_stage(x, n, hw, params["w_out"], (1, 1), (0, 0), None,
                             lrelu=False, out_dtype=F32)
        out_nchw = (y.reshape(co_out, n, hw2[0] * hw2[1])
                    .transpose(1, 0, 2).reshape(n, co_out, hw2[0], hw2[1]))

    if encoder:
        return out_nchw
    return out_nchw.reshape(-1)          # == output.view(-1, 1).squeeze(1)
    # TODO(synk): return_hidden=True path references an undefined `output_tmp`
    # in the original source, so it is not implemented.


# ----------------------------------------------------------------------------
# pure-JAX reference (for self-check only)
# ----------------------------------------------------------------------------
def netd2_forward_ref(x, params, laterals, encoder=False):
    def conv(v, w, stride, pad):
        return lax.conv_general_dilated(
            v, w, window_strides=stride,
            padding=[(pad[0], pad[0]), (pad[1], pad[1])],
            dimension_numbers=("NCHW", "OIHW", "NCHW"),
            precision=lax.Precision.HIGHEST)

    def lrelu(v):
        return jnp.where(v >= 0, v, LRELU_SLOPE * v)

    def bn(v, gamma, beta):
        mean = jnp.mean(v, axis=(0, 2, 3), keepdims=True)
        var = jnp.mean((v - mean) ** 2, axis=(0, 2, 3), keepdims=True)
        return ((v - mean) / jnp.sqrt(var + BN_EPS)
                * gamma[None, :, None, None] + beta[None, :, None, None])

    l = lrelu(conv(x, params["w1"], (2, 2), (1, 1)))
    l = lrelu(conv(l, params["w3"], (2, 2), (1, 1)) * laterals[0])
    l = lrelu(bn(conv(l, params["w5"], (2, 2), (1, 1)) * laterals[1],
                 params["bn6_gamma"], params["bn6_beta"]))
    l = lrelu(conv(l, params["w8"], (2, 2), (1, 1)) * laterals[2])
    l = lrelu(bn(conv(l, params["w10"], (2, 2), (1, 1)) * laterals[3],
                 params["bn11_gamma"], params["bn11_beta"]))
    l = lrelu(bn(conv(l, params["w13"], (2, 2), (0, 1)) * laterals[4],
                 params["bn14_gamma"], params["bn14_beta"]))
    out = conv(l, params["w_out"], (1, 1), (0, 0))
    if encoder:
        return out
    return out.reshape(-1)


# ----------------------------------------------------------------------------
# deterministic parameter init (synthetic; shapes follow netD2.__init__)
# ----------------------------------------------------------------------------
def init_params(key, ndf=8, nc=2, nz=1, lf=(1, 8)):
    ks = jax.random.split(key, 13)

    def w(k, shape):
        return 0.1 * jax.random.normal(k, shape, dtype=F32)

    return {
        "w1": w(ks[0], (ndf, nc, 4, 4)),
        "w3": w(ks[1], (ndf * 2, ndf, 4, 4)),
        "w5": w(ks[2], (ndf * 2, ndf * 2, 3, 3)),
        "w8": w(ks[3], (ndf * 4, ndf * 2, 3, 3)),
        "w10": w(ks[4], (ndf * 4, ndf * 4, 3, 3)),
        "w13": w(ks[5], (ndf * 8, ndf * 4, 2, 4)),
        "w_out": w(ks[6], (nz, ndf * 8, lf[0], lf[1])),
        "bn6_gamma": 1.0 + 0.1 * jax.random.normal(ks[7], (ndf * 2,), dtype=F32),
        "bn6_beta": 0.1 * jax.random.normal(ks[8], (ndf * 2,), dtype=F32),
        "bn11_gamma": 1.0 + 0.1 * jax.random.normal(ks[9], (ndf * 4,), dtype=F32),
        "bn11_beta": 0.1 * jax.random.normal(ks[10], (ndf * 4,), dtype=F32),
        "bn14_gamma": 1.0 + 0.1 * jax.random.normal(ks[11], (ndf * 8,), dtype=F32),
        "bn14_beta": 0.1 * jax.random.normal(ks[12], (ndf * 8,), dtype=F32),
    }


if __name__ == "__main__":
    key = jax.random.PRNGKey(0)
    # shrink channels (ndf=8 instead of 64) but keep the spatial size large enough
    # for the fixed (2,4)-stride-2 and (1,8) tail convs to be valid.
    ndf, nc, nz, lf = 8, 2, 1, (1, 8)
    N, H, W = 2, 64, 512

    k_in, k_lat, k_par = jax.random.split(key, 3)
    x = jax.random.normal(k_in, (N, nc, H, W), dtype=F32)
    params = init_params(k_par, ndf=ndf, nc=nc, nz=nz, lf=lf)

    # lateral tensors must match l3, l5, l8, l10, l13 (NCHW)
    h1, w1_ = _conv_out_hw(H, W, 4, 4, 2, 2, 1, 1)
    h3, w3_ = _conv_out_hw(h1, w1_, 4, 4, 2, 2, 1, 1)
    h5, w5_ = _conv_out_hw(h3, w3_, 3, 3, 2, 2, 1, 1)
    h8, w8_ = _conv_out_hw(h5, w5_, 3, 3, 2, 2, 1, 1)
    h10, w10_ = _conv_out_hw(h8, w8_, 3, 3, 2, 2, 1, 1)
    h13, w13_ = _conv_out_hw(h10, w10_, 2, 4, 2, 2, 0, 1)
    lat_shapes = [(N, ndf * 2, h3, w3_), (N, ndf * 2, h5, w5_),
                  (N, ndf * 4, h8, w8_), (N, ndf * 4, h10, w10_),
                  (N, ndf * 8, h13, w13_)]
    lat_keys = jax.random.split(k_lat, 5)
    laterals = [1.0 + 0.25 * jax.random.normal(k, s, dtype=F32)
                for k, s in zip(lat_keys, lat_shapes)]

    out = jax.block_until_ready(netd2_forward_pallas(x, params, laterals))
    ref = jax.block_until_ready(netd2_forward_ref(x, params, laterals))

    assert out.shape == ref.shape, (out.shape, ref.shape)
    assert bool(jnp.all(jnp.isfinite(out)))
    assert bool(jnp.allclose(out, ref, rtol=5e-2, atol=5e-2)), (out, ref)
    print("KERNEL_OK")
</pallas_src>

<mosaic_0001>
module attributes {stable_mosaic.version = 11 : i64} {
  func.func @_conv_kernel(%arg0: i32, %arg1: memref<32x16384xbf16, #tpu.memory_space<vmem>>, %arg2: memref<8x32xbf16, #tpu.memory_space<vmem>>, %arg3: memref<8x16384xbf16, #tpu.memory_space<vmem>>) attributes {dimension_semantics = [#tpu.dimension_semantics<parallel>], iteration_bounds = array<i64: 1>, scalar_prefetch = 0 : i64, scratch_operands = 0 : i64, tpu.core_type = #tpu.core_type<tc>, window_params = [{transform_indices = @transform_0, window_bounds = array<i64: 32, 16384>}, {pipeline_mode = #tpu.pipeline_mode<synchronous>, transform_indices = @transform_1, window_bounds = array<i64: 8, 32>}, {transform_indices = @transform_2, window_bounds = array<i64: 8, 16384>}]} {
    %c0 = arith.constant 0 : index
    %c0_0 = arith.constant 0 : index
    %0 = vector.load %arg2[%c0, %c0_0] : memref<8x32xbf16, #tpu.memory_space<vmem>>, vector<8x32xbf16>
    %c0_1 = arith.constant 0 : index
    %c0_2 = arith.constant 0 : index
    %1 = vector.load %arg1[%c0_1, %c0_2] : memref<32x16384xbf16, #tpu.memory_space<vmem>>, vector<32x16384xbf16>
    %cst = arith.constant dense<0.000000e+00> : vector<8x16384xf32>
    %2 = tpu.matmul %0, %1, %cst {dimension_numbers = #tpu.dot_dimension_numbers<[1], [0], [0], [1], [0, 0, 1, 1], [], []>} : vector<8x32xbf16>, vector<32x16384xbf16>, vector<8x16384xf32> -> vector<8x16384xf32>
    %cst_3 = arith.constant 0.000000e+00 : f32
    %3 = vector.broadcast %cst_3 : f32 to vector<8x16384xf32>
    %4 = arith.cmpf oge, %2, %3 : vector<8x16384xf32>
    %cst_4 = arith.constant 2.000000e-01 : f32
    %5 = vector.broadcast %cst_4 : f32 to vector<8x16384xf32>
    %6 = arith.mulf %5, %2 : vector<8x16384xf32>
    %7 = arith.select %4, %2, %6 : vector<8x16384xi1>, vector<8x16384xf32>
    %8 = arith.truncf %7 : vector<8x16384xf32> to vector<8x16384xbf16>
    %c0_5 = arith.constant 0 : index
    %c0_6 = arith.constant 0 : index
    %9 = vector.load %arg3[%c0_5, %c0_6] : memref<8x16384xbf16, #tpu.memory_space<vmem>>, vector<8x16384xbf16>
    tpu.vector_store %arg3[%c0_5, %c0_6], %8 {strides = array<i32>} : memref<8x16384xbf16, #tpu.memory_space<vmem>>, vector<8x16384xbf16>,
    return
  }
  func.func @transform_0(%arg0: i32) -> (i32, i32) {
    %c0_i32 = arith.constant 0 : i32
    %c0_i32_0 = arith.constant 0 : i32
    return %c0_i32, %arg0 : i32, i32
  }
  func.func @transform_1(%arg0: i32) -> (i32, i32) {
    %c0_i32 = arith.constant 0 : i32
    %c0_i32_0 = arith.constant 0 : i32
    %c0_i32_1 = arith.constant 0 : i32
    return %c0_i32, %c0_i32_0 : i32, i32
  }
  func.func @transform_2(%arg0: i32) -> (i32, i32) {
    %c0_i32 = arith.constant 0 : i32
    %c0_i32_0 = arith.constant 0 : i32
    return %c0_i32, %arg0 : i32, i32
  }
}

</mosaic_0001>

<bundles_post_ra>
// kernel: tpu_custom_call.1
= control target key start
LH: loop header
LB: loop body
LE: loop exit
PB: predicated region body
PF: predicated region fallthrough
CT: control target
= control target key end

     0   :  { %7 = vsyncpa [#allocation3], 0  ;;  %s6020_s0 = inlined_call_operand.hbm [shape: bf16[32,16384], index: 0, kind: input, shape index: {}]   ;;  %s6021_s1 = inlined_call_operand.hbm [shape: bf16[8,32], index: 1, kind: input, shape index: {}]   ;;  %s6022_s2 = inlined_call_operand.hbm [shape: bf16[8,16384], index: 2, kind: output, shape index: {}]  }
   0x1   :  { %8 = vsyncpa [#allocation6], 0 }
   0x2   :  { %9 = vsyncpa [#allocation4], 0  ;;  %s5707_s9 = smov [#allocation2]   ;;  %s5635_s13 = scalar_lea.hbm %s6020_s0, 32768 }
   0x3   :  { %s15_s10 = sshll.u32 %s5707_s9, 4  ;;  %p5636_p0 = scmp.ne.s32.totalorder %s6020_s0, %s5635_s13  ;;  %s16_s10 = int_to_ptr.vmem [resolvable:$true] %s15_s10 }
   0x4   :  { %p5639_p1 = scmp.lt.u32.totalorder %s5635_s13, %s6020_s0 }
   0x6   :  { %p5641_p2 = pnand %p5639_p1, %p5636_p0 }
   0x8   :  { %5644 = shalt.err (!%p5641_p2)
}
   0x9   :  { %s5645_s18 = scalar_lea.vmem %s16_s10, 32768  ;;  %p5650_p4 = scmp.lt.s32.totalorder %s16_s10, %s16_s10 }
   0xa   :  { %p5646_p3 = scmp.ne.s32.totalorder %s16_s10, %s5645_s18  ;;  %p5651_p5 = scmp.lt.s32.totalorder %s5645_s18, %s5645_s18 }
   0xc   :  { %p5652_p6 = por %p5651_p5, %p5650_p4 }
   0xe   :  { %p5653_p7 = pnand %p5652_p6, %p5646_p3 }
  0x10   :  { %5656 = shalt.err (!%p5653_p7)
}
  0x11   :  { %s5708_s19 = smov 8192   ;;  %s5709_s20 = smov 512  }
  0x12   :  { %21 = dma.hbm_to_vmem [thread:$0]  %s6020_s0, 32768, %s16_s10, [#allocation3], %s5708_s19, %s5708_s19, %s5709_s20  }
  0x13   :  { %s5710_s23 = smov [#allocation5]   ;;  %s5657_s27 = scalar_lea.hbm %s6021_s1, 64 }
  0x14   :  { %s28_s24 = sshll.u32 %s5710_s23, 4  ;;  %p5658_p8 = scmp.ne.s32.totalorder %s6021_s1, %s5657_s27  ;;  %s29_s24 = int_to_ptr.vmem [resolvable:$true] %s28_s24 }
  0x15   :  { %p5661_p9 = scmp.lt.u32.totalorder %s5657_s27, %s6021_s1 }
  0x17   :  { %p5663_p10 = pnand %p5661_p9, %p5658_p8 }
  0x19   :  { %5666 = shalt.err (!%p5663_p10)
}
  0x1a   :  { %s5667_s4 = scalar_lea.vmem %s29_s24, 64  ;;  %p5672_p12 = scmp.lt.s32.totalorder %s29_s24, %s29_s24 }
  0x1b   :  { %p5668_p11 = scmp.ne.s32.totalorder %s29_s24, %s5667_s4  ;;  %p5673_p13 = scmp.lt.s32.totalorder %s5667_s4, %s5667_s4 }
  0x1d   :  { %p5674_p0 = por %p5673_p13, %p5672_p12 }
  0x1f   :  { %p5675_p1 = pnand %p5674_p0, %p5668_p11 }
  0x21   :  { %5678 = shalt.err (!%p5675_p1)
}
  0x22   :  { %31 = dma.hbm_to_vmem [thread:$0]  %s6021_s1, 64, %s29_s24, [#allocation6]  }
  0x23   :  { %5701 = dma.done.wait [#allocation3], 32768  }
  0x24   :  { %5702 = vsyncadd [#allocation3], 4294934528 }
  0x25   :  { %5703 = dma.done.wait [#allocation6], 64  }
  0x26   :  { %5704 = vsyncadd [#allocation6], 4294967232  ;;  %v5711_v0 = vmov 0   ;;  %v40_v1 = vld [vmem:[#allocation2] sm:$0xff]  ;;  %v41_v3 = vld [vmem:[#allocation2 + $0x8] sm:$0xff]  ;;  %vm1576_vm0 = vcmask 261120  }
  0x27   :  { %1612 = vmatprep.mubr.bf16.mxu0 %v5711_v0  ;;  %1653 = vmatprep.mubr.bf16.mxu1 %v5711_v0  ;;  %v104_v2 = vld [vmem:[#allocation2 + $0x200] sm:$0xff]  ;;  %v105_v5 = vld [vmem:[#allocation2 + $0x208] sm:$0xff]  ;;  %v42_v15 = vld [vmem:[#allocation2 + $0x10] sm:$0xff]  ;;  %s5712_s1 = smov [#allocation7]  }
  0x28   :  { %v5181_v4 = vcombine.high %v40_v1, %v104_v2  ;;  %v5180_v6 = vcombine.low %v40_v1, %v104_v2  ;;  %v168_v7 = vld [vmem:[#allocation2 + $0x400] sm:$0xff]  ;;  %v5183_v9 = vcombine.high %v41_v3, %v105_v5  ;;  %v5182_v10 = vcombine.low %v41_v3, %v105_v5  ;;  %v169_v12 = vld [vmem:[#allocation2 + $0x408] sm:$0xff]  ;;  %v106_v16 = vld [vmem:[#allocation2 + $0x210] sm:$0xff]  ;;  %s5170_s6 = sshll.u32 %s5712_s1, 4  ;;  %s5171_s6 = int_to_ptr.vmem [resolvable:$true] %s5170_s6 }
  0x29   :  { %v232_v8 = vld [vmem:[#allocation2 + $0x600] sm:$0xff]  ;;  %v233_v13 = vld [vmem:[#allocation2 + $0x608] sm:$0xff]  ;;  %v43_v17 = vld [vmem:[#allocation2 + $0x18] sm:$0xff]  ;;  %v5185_v21 = vcombine.high %v42_v15, %v106_v16  ;;  %v5184_v28 = vcombine.low %v42_v15, %v106_v16  ;;  %s5679_s7 = scalar_lea.vmem %s5171_s6, 8192  ;;  %p5684_p3 = scmp.lt.s32.totalorder %s5171_s6, %s5171_s6 }
  0x2a   :  { %v5309_v11 = vcombine.high %v168_v7, %v232_v8  ;;  %1580 = vmatprep.subr.bf16.mxu0 %v5181_v4  ;;  %v5311_v14 = vcombine.high %v169_v12, %v233_v13  ;;  %1621 = vmatprep.subr.bf16.mxu1 %v5183_v9  ;;  %v5308_v18 = vcombine.low %v168_v7, %v232_v8  ;;  %v107_v19 = vld [vmem:[#allocation2 + $0x218] sm:$0xff]  ;;  %v170_v23 = vld [vmem:[#allocation2 + $0x410] sm:$0xff]  ;;  %v5754_v27 = vld [vmem:[#allocation5] sm:$0xf]  ;;  %p5680_p2 = scmp.ne.s32.totalorder %s5171_s6, %s5679_s7  ;;  %p5685_p4 = scmp.lt.s32.totalorder %s5679_s7, %s5679_s7 }
  0x2b   :  { %1581 = vmatpush1.bf16.msra.mxu0 %v5180_v6  ;;  %1622 = vmatpush1.bf16.msra.mxu1 %v5182_v10  ;;  %v5310_v20 = vcombine.low %v169_v12, %v233_v13  ;;  %v5187_v22 = vcombine.high %v43_v17, %v107_v19  ;;  %v234_v24 = vld [vmem:[#allocation2 + $0x610] sm:$0xff]  ;;  %v171_v25 = vld [vmem:[#allocation2 + $0x418] sm:$0xff]  ;;  %v5186_v29 = vcombine.low %v43_v17, %v107_v19  ;;  %v44_v32 = vld [vmem:[#allocation2 + $0x20] sm:$0xff] }
  0x2c   :  { %1582 = vmatprep.subr.bf16.mxu0 %v5309_v11  ;;  %1623 = vmatprep.subr.bf16.mxu1 %v5311_v14  ;;  %v235_v26 = vld [vmem:[#allocation2 + $0x618] sm:$0xff]  ;;  %v5313_v30 = vcombine.high %v170_v23, %v234_v24  ;;  %v108_v33 = vld [vmem:[#allocation2 + $0x220] sm:$0xff]  ;;  %v45_v34 = vld [vmem:[#allocation2 + $0x28] sm:$0xff]  ;;  %v5312_v36 = vcombine.low %v170_v23, %v234_v24  ;;  %p5686_p5 = por %p5685_p4, %p5684_p3 }
  0x2d   :  { %v5315_v31 = vcombine.high %v171_v25, %v235_v26  ;;  %v109_v35 = vld [vmem:[#allocation2 + $0x228] sm:$0xff]  ;;  %v5314_v37 = vcombine.low %v171_v25, %v235_v26  ;;  %v5189_v38 = vcombine.high %v44_v32, %v108_v33  ;;  %v172_v40 = vld [vmem:[#allocation2 + $0x420] sm:$0xff]  ;;  %v5188_v44 = vcombine.low %v44_v32, %v108_v33  ;;  %v46_v48 = vld [vmem:[#allocation2 + $0x30] sm:$0xff] }
  0x2e   :  { %v5191_v39 = vcombine.high %v45_v34, %v109_v35  ;;  %v236_v41 = vld [vmem:[#allocation2 + $0x620] sm:$0xff]  ;;  %v173_v42 = vld [vmem:[#allocation2 + $0x428] sm:$0xff]  ;;  %v5190_v45 = vcombine.low %v45_v34, %v109_v35  ;;  %v110_v49 = vld [vmem:[#allocation2 + $0x230] sm:$0xff]  ;;  %p5687_p6 = pnand %p5686_p5, %p5680_p2 }
  0x2f   :  { %1583 = vmatpush1.bf16.msra.mxu0 %v5308_v18  ;;  %1624 = vmatpush1.bf16.msra.mxu1 %v5310_v20  ;;  %v237_v43 = vld [vmem:[#allocation2 + $0x628] sm:$0xff]  ;;  %v5317_v46 = vcombine.high %v172_v40, %v236_v41  ;;  %v47_v50 = vld [vmem:[#allocation2 + $0x38] sm:$0xff]  ;;  %v5316_v52 = vcombine.low %v172_v40, %v236_v41  ;;  %v5193_v54 = vcombine.high %v46_v48, %v110_v49  ;;  %v174_v56 = vld [vmem:[#allocation2 + $0x430] sm:$0xff] }
  0x30   :  { %1662 = vmatprep.subr.bf16.mxu0 %v5185_v21  ;;  %1703 = vmatprep.subr.bf16.mxu1 %v5187_v22  ;;  %v5319_v47 = vcombine.high %v173_v42, %v237_v43  ;;  %v111_v51 = vld [vmem:[#allocation2 + $0x238] sm:$0xff]  ;;  %v5318_v53 = vcombine.low %v173_v42, %v237_v43  ;;  %v238_v57 = vld [vmem:[#allocation2 + $0x630] sm:$0xff]  ;;  %v5192_v60 = vcombine.low %v46_v48, %v110_v49  ;;  %v48_v1 = vld [vmem:[#allocation2 + $0x40] sm:$0xff] }
  0x31   :  { %v5195_v55 = vcombine.high %v47_v50, %v111_v51  ;;  %v175_v58 = vld [vmem:[#allocation2 + $0x438] sm:$0xff]  ;;  %v5194_v61 = vcombine.low %v47_v50, %v111_v51  ;;  %v5321_v62 = vcombine.high %v174_v56, %v238_v57  ;;  %v112_v2 = vld [vmem:[#allocation2 + $0x240] sm:$0xff]  ;;  %v49_v3 = vld [vmem:[#allocation2 + $0x48] sm:$0xff]  ;;  %v5320_v5 = vcombine.low %v174_v56, %v238_v57 }
  0x32   :  { %5436 = vmatmul.mubr.msk.bf16.vlgmr.msra.gmra.mrb[0].mxu0 %vm1576_vm0, %v5754_v27  ;;  %5437 = vmatmul.mubr.msk.bf16.vlgmr.msra.gmra.mrb[0].mxu1 %vm1576_vm0, %v5754_v27  ;;  %v239_v59 = vld [vmem:[#allocation2 + $0x638] sm:$0xff]  ;;  %v113_v4 = vld [vmem:[#allocation2 + $0x248] sm:$0xff]  ;;  %v5197_v7 = vcombine.high %v48_v1, %v112_v2  ;;  %v176_v9 = vld [vmem:[#allocation2 + $0x440] sm:$0xff]  ;;  %v5196_v13 = vcombine.low %v48_v1, %v112_v2 }
  0x33   :  { %1663 = vmatpush1.bf16.msra.mxu0 %v5184_v28  ;;  %1704 = vmatpush1.bf16.msra.mxu1 %v5186_v29  ;;  %v5323_v63 = vcombine.high %v175_v58, %v239_v59  ;;  %v5322_v6 = vcombine.low %v175_v58, %v239_v59  ;;  %v5199_v8 = vcombine.high %v49_v3, %v113_v4  ;;  %v240_v10 = vld [vmem:[#allocation2 + $0x640] sm:$0xff]  ;;  %v177_v11 = vld [vmem:[#allocation2 + $0x448] sm:$0xff]  ;;  %v50_v17 = vld [vmem:[#allocation2 + $0x50] sm:$0xff] }
  0x34   :  { %1664 = vmatprep.subr.bf16.mxu0 %v5313_v30  ;;  %1705 = vmatprep.subr.bf16.mxu1 %v5315_v31  ;;  %v241_v12 = vld [vmem:[#allocation2 + $0x648] sm:$0xff]  ;;  %v5198_v14 = vcombine.low %v49_v3, %v113_v4  ;;  %v5325_v15 = vcombine.high %v176_v9, %v240_v10  ;;  %v114_v18 = vld [vmem:[#allocation2 + $0x250] sm:$0xff]  ;;  %v51_v19 = vld [vmem:[#allocation2 + $0x58] sm:$0xff]  ;;  %v5324_v21 = vcombine.low %v176_v9, %v240_v10 }
  0x35   :  { %1694 = vmatprep.mubr.bf16.mxu0 %v5711_v0  ;;  %1735 = vmatprep.mubr.bf16.mxu1 %v5711_v0  ;;  %v5327_v16 = vcombine.high %v177_v11, %v241_v12  ;;  %v115_v20 = vld [vmem:[#allocation2 + $0x258] sm:$0xff]  ;;  %v5326_v22 = vcombine.low %v177_v11, %v241_v12  ;;  %v5201_v23 = vcombine.high %v50_v17, %v114_v18  ;;  %v178_v25 = vld [vmem:[#allocation2 + $0x450] sm:$0xff]  ;;  %v52_v34 = vld [vmem:[#allocation2 + $0x60] sm:$0xff] }
  0x36   :  { %v5203_v24 = vcombine.high %v51_v19, %v115_v20  ;;  %v242_v26 = vld [vmem:[#allocation2 + $0x650] sm:$0xff]  ;;  %v179_v28 = vld [vmem:[#allocation2 + $0x458] sm:$0xff]  ;;  %v5200_v30 = vcombine.low %v50_v17, %v114_v18  ;;  %v5202_v31 = vcombine.low %v51_v19, %v115_v20  ;;  %v116_v35 = vld [vmem:[#allocation2 + $0x260] sm:$0xff] }
  0x37   :  { %1665 = vmatpush1.bf16.msra.mxu0 %v5312_v36  ;;  %1706 = vmatpush1.bf16.msra.mxu1 %v5314_v37  ;;  %v243_v29 = vld [vmem:[#allocation2 + $0x658] sm:$0xff]  ;;  %v5329_v32 = vcombine.high %v178_v25, %v242_v26  ;;  %v53_v36 = vld [vmem:[#allocation2 + $0x68] sm:$0xff]  ;;  %v5205_v40 = vcombine.high %v52_v34, %v116_v35  ;;  %v180_v42 = vld [vmem:[#allocation2 + $0x460] sm:$0xff] }
  0x38   :  { %1744 = vmatprep.subr.bf16.mxu0 %v5189_v38  ;;  %1785 = vmatprep.subr.bf16.mxu1 %v5191_v39  ;;  %v5331_v33 = vcombine.high %v179_v28, %v243_v29  ;;  %v117_v37 = vld [vmem:[#allocation2 + $0x268] sm:$0xff]  ;;  %v5328_v38 = vcombine.low %v178_v25, %v242_v26  ;;  %v5330_v39 = vcombine.low %v179_v28, %v243_v29  ;;  %v244_v43 = vld [vmem:[#allocation2 + $0x660] sm:$0xff]  ;;  %v54_v50 = vld [vmem:[#allocation2 + $0x70] sm:$0xff] }
  0x39   :  { %v5207_v41 = vcombine.high %v53_v36, %v117_v37  ;;  %v5333_v48 = vcombine.high %v180_v42, %v244_v43  ;;  %v118_v51 = vld [vmem:[#allocation2 + $0x270] sm:$0xff]  ;;  %v56_v3 = vld [vmem:[#allocation2 + $0x80] sm:$0xff] }
  0x3a   :  { %5438 = vmatmul.mubr.msk.bf16.vlgmr.msra.gmra.mrb[4].mxu0 %vm1576_vm0, %v5754_v27  ;;  %5439 = vmatmul.mubr.msk.bf16.vlgmr.msra.gmra.mrb[4].mxu1 %vm1576_vm0, %v5754_v27  ;;  %v5209_v56 = vcombine.high %v54_v50, %v118_v51  ;;  %v182_v58 = vld [vmem:[#allocation2 + $0x470] sm:$0xff]  ;;  %v120_v4 = vld [vmem:[#allocation2 + $0x280] sm:$0xff] }
  0x3b   :  { %1745 = vmatpush1.bf16.msra.mxu0 %v5188_v44  ;;  %1786 = vmatpush1.bf16.msra.mxu1 %v5190_v45  ;;  %v181_v44 = vld [vmem:[#allocation2 + $0x468] sm:$0xff]  ;;  %v246_v59 = vld [vmem:[#allocation2 + $0x670] sm:$0xff]  ;;  %v5213_v9 = vcombine.high %v56_v3, %v120_v4  ;;  %v184_v11 = vld [vmem:[#allocation2 + $0x480] sm:$0xff] }
  0x3c   :  { %1746 = vmatprep.subr.bf16.mxu0 %v5317_v46  ;;  %1787 = vmatprep.subr.bf16.mxu1 %v5319_v47  ;;  %v245_v45 = vld [vmem:[#allocation2 + $0x668] sm:$0xff]  ;;  %v5204_v46 = vcombine.low %v52_v34, %v116_v35  ;;  %v5206_v47 = vcombine.low %v53_v36, %v117_v37  ;;  %v5337_v1 = vcombine.high %v182_v58, %v246_v59  ;;  %v248_v12 = vld [vmem:[#allocation2 + $0x680] sm:$0xff]  ;;  %v58_v19 = vld [vmem:[#allocation2 + $0x90] sm:$0xff] }
  0x3d   :  { %1776 = vmatprep.mubr.bf16.mxu0 %v5711_v0  ;;  %1817 = vmatprep.mubr.bf16.mxu1 %v5711_v0  ;;  %v5335_v49 = vcombine.high %v181_v44, %v245_v45  ;;  %v5341_v17 = vcombine.high %v184_v11, %v248_v12  ;;  %v122_v20 = vld [vmem:[#allocation2 + $0x290] sm:$0xff]  ;;  %v60_v36 = vld [vmem:[#allocation2 + $0xa0] sm:$0xff] }
  0x3e   :  { %v5217_v25 = vcombine.high %v58_v19, %v122_v20  ;;  %v186_v28 = vld [vmem:[#allocation2 + $0x490] sm:$0xff]  ;;  %v124_v37 = vld [vmem:[#allocation2 + $0x2a0] sm:$0xff] }
  0x3f   :  { %1747 = vmatpush1.bf16.msra.mxu0 %v5316_v52  ;;  %1788 = vmatpush1.bf16.msra.mxu1 %v5318_v53  ;;  %v55_v52 = vld [vmem:[#allocation2 + $0x78] sm:$0xff]  ;;  %v250_v29 = vld [vmem:[#allocation2 + $0x690] sm:$0xff] }
  0x40   :  { %1826 = vmatprep.subr.bf16.mxu0 %v5193_v54  ;;  %1867 = vmatprep.subr.bf16.mxu1 %v5195_v55  ;;  %v119_v53 = vld [vmem:[#allocation2 + $0x278] sm:$0xff]  ;;  %v5332_v54 = vcombine.low %v180_v42, %v244_v43  ;;  %v5334_v55 = vcombine.low %v181_v44, %v245_v45  ;;  %v5345_v34 = vcombine.high %v186_v28, %v250_v29  ;;  %v188_v44 = vld [vmem:[#allocation2 + $0x4a0] sm:$0xff] }
  0x41   :  { %v5211_v57 = vcombine.high %v55_v52, %v119_v53  ;;  %v5221_v42 = vcombine.high %v60_v36, %v124_v37  ;;  %v252_v45 = vld [vmem:[#allocation2 + $0x6a0] sm:$0xff] }
  0x42   :  { %5440 = vmatmul.mubr.msk.bf16.vlgmr.msra.gmra.mrb[8].mxu0 %vm1576_vm0, %v5754_v27  ;;  %5441 = vmatmul.mubr.msk.bf16.vlgmr.msra.gmra.mrb[8].mxu1 %vm1576_vm0, %v5754_v27 }
  0x43   :  { %1827 = vmatpush1.bf16.msra.mxu0 %v5192_v60  ;;  %1868 = vmatpush1.bf16.msra.mxu1 %v5194_v61  ;;  %v183_v60 = vld [vmem:[#allocation2 + $0x478] sm:$0xff] }
  0x44   :  { %1828 = vmatprep.subr.bf16.mxu0 %v5321_v62  ;;  %1869 = vmatprep.subr.bf16.mxu1 %v5323_v63  ;;  %v247_v61 = vld [vmem:[#allocation2 + $0x678] sm:$0xff]  ;;  %v5208_v62 = vcombine.low %v54_v50, %v118_v51  ;;  %v5210_v63 = vcombine.low %v55_v52, %v119_v53  ;;  %v5349_v50 = vcombine.high %v188_v44, %v252_v45  ;;  %v62_v52 = vld [vmem:[#allocation2 + $0xb0] sm:$0xff] }
  0x45   :  { %1858 = vmatprep.mubr.bf16.mxu0 %v5711_v0  ;;  %1899 = vmatprep.mubr.bf16.mxu1 %v5711_v0  ;;  %v5339_v2 = vcombine.high %v183_v60, %v247_v61  ;;  %v126_v53 = vld [vmem:[#allocation2 + $0x2b0] sm:$0xff] }
  0x47   :  { %1829 = vmatpush1.bf16.msra.mxu0 %v5320_v5  ;;  %1870 = vmatpush1.bf16.msra.mxu1 %v5322_v6  ;;  %v57_v5 = vld [vmem:[#allocation2 + $0x88] sm:$0xff] }
  0x48   :  { %1908 = vmatprep.subr.bf16.mxu0 %v5197_v7  ;;  %1949 = vmatprep.subr.bf16.mxu1 %v5199_v8  ;;  %v121_v6 = vld [vmem:[#allocation2 + $0x288] sm:$0xff]  ;;  %v5336_v7 = vcombine.low %v182_v58, %v246_v59  ;;  %v5338_v8 = vcombine.low %v183_v60, %v247_v61  ;;  %v5225_v58 = vcombine.high %v62_v52, %v126_v53  ;;  %v190_v60 = vld [vmem:[#allocation2 + $0x4b0] sm:$0xff] }
  0x49   :  { %v5215_v10 = vcombine.high %v57_v5, %v121_v6  ;;  %v254_v61 = vld [vmem:[#allocation2 + $0x6b0] sm:$0xff] }
  0x4a   :  { %5442 = vmatmul.mubr.msk.bf16.vlgmr.msra.gmra.mrb[12].mxu0 %vm1576_vm0, %v5754_v27  ;;  %5443 = vmatmul.mubr.msk.bf16.vlgmr.msra.gmra.mrb[12].mxu1 %vm1576_vm0, %v5754_v27 }
  0x4b   :  { %1909 = vmatpush1.bf16.msra.mxu0 %v5196_v13  ;;  %1950 = vmatpush1.bf16.msra.mxu1 %v5198_v14  ;;  %v185_v13 = vld [vmem:[#allocation2 + $0x488] sm:$0xff] }
  0x4c   :  { %1910 = vmatprep.subr.bf16.mxu0 %v5325_v15  ;;  %1951 = vmatprep.subr.bf16.mxu1 %v5327_v16  ;;  %v249_v14 = vld [vmem:[#allocation2 + $0x688] sm:$0xff]  ;;  %v5212_v15 = vcombine.low %v56_v3, %v120_v4  ;;  %v5214_v16 = vcombine.low %v57_v5, %v121_v6  ;;  %v5353_v3 = vcombine.high %v190_v60, %v254_v61  ;;  %v64_v5 = vld [vmem:[#allocation2 + $0xc0] sm:$0xff] }
  0x4d   :  { %1940 = vmatprep.mubr.bf16.mxu0 %v5711_v0  ;;  %1981 = vmatprep.mubr.bf16.mxu1 %v5711_v0  ;;  %v5343_v18 = vcombine.high %v185_v13, %v249_v14  ;;  %v128_v6 = vld [vmem:[#allocation2 + $0x2c0] sm:$0xff] }
  0x4f   :  { %1911 = vmatpush1.bf16.msra.mxu0 %v5324_v21  ;;  %1952 = vmatpush1.bf16.msra.mxu1 %v5326_v22  ;;  %v59_v21 = vld [vmem:[#allocation2 + $0x98] sm:$0xff] }
  0x50   :  { %1990 = vmatprep.subr.bf16.mxu0 %v5201_v23  ;;  %2031 = vmatprep.subr.bf16.mxu1 %v5203_v24  ;;  %v123_v22 = vld [vmem:[#allocation2 + $0x298] sm:$0xff]  ;;  %v5340_v23 = vcombine.low %v184_v11, %v248_v12  ;;  %v5342_v24 = vcombine.low %v185_v13, %v249_v14  ;;  %v5229_v11 = vcombine.high %v64_v5, %v128_v6  ;;  %v192_v13 = vld [vmem:[#allocation2 + $0x4c0] sm:$0xff] }
  0x51   :  { %v5219_v26 = vcombine.high %v59_v21, %v123_v22  ;;  %v256_v14 = vld [vmem:[#allocation2 + $0x6c0] sm:$0xff] }
  0x52   :  { %5444 = vmatmul.mubr.msk.bf16.vlgmr.msra.gmra.mrb[16].mxu0 %vm1576_vm0, %v5754_v27  ;;  %5445 = vmatmul.mubr.msk.bf16.vlgmr.msra.gmra.mrb[16].mxu1 %vm1576_vm0, %v5754_v27 }
  0x53   :  { %1991 = vmatpush1.bf16.msra.mxu0 %v5200_v30  ;;  %2032 = vmatpush1.bf16.msra.mxu1 %v5202_v31  ;;  %v187_v30 = vld [vmem:[#allocation2 + $0x498] sm:$0xff] }
  0x54   :  { %1992 = vmatprep.subr.bf16.mxu0 %v5329_v32  ;;  %2033 = vmatprep.subr.bf16.mxu1 %v5331_v33  ;;  %v251_v31 = vld [vmem:[#allocation2 + $0x698] sm:$0xff]  ;;  %v5216_v32 = vcombine.low %v58_v19, %v122_v20  ;;  %v5218_v33 = vcombine.low %v59_v21, %v123_v22  ;;  %v5357_v19 = vcombine.high %v192_v13, %v256_v14  ;;  %v66_v21 = vld [vmem:[#allocation2 + $0xd0] sm:$0xff] }
  0x55   :  { %2022 = vmatprep.mubr.bf16.mxu0 %v5711_v0  ;;  %2063 = vmatprep.mubr.bf16.mxu1 %v5711_v0  ;;  %v5347_v35 = vcombine.high %v187_v30, %v251_v31  ;;  %v130_v22 = vld [vmem:[#allocation2 + $0x2d0] sm:$0xff] }
  0x57   :  { %1993 = vmatpush1.bf16.msra.mxu0 %v5328_v38  ;;  %2034 = vmatpush1.bf16.msra.mxu1 %v5330_v39  ;;  %v61_v38 = vld [vmem:[#allocation2 + $0xa8] sm:$0xff] }
  0x58   :  { %2072 = vmatprep.subr.bf16.mxu0 %v5205_v40  ;;  %2113 = vmatprep.subr.bf16.mxu1 %v5207_v41  ;;  %v125_v39 = vld [vmem:[#allocation2 + $0x2a8] sm:$0xff]  ;;  %v5344_v40 = vcombine.low %v186_v28, %v250_v29  ;;  %v5346_v41 = vcombine.low %v187_v30, %v251_v31  ;;  %v5233_v28 = vcombine.high %v66_v21, %v130_v22  ;;  %v194_v30 = vld [vmem:[#allocation2 + $0x4d0] sm:$0xff] }
  0x59   :  { %v5223_v43 = vcombine.high %v61_v38, %v125_v39  ;;  %v258_v31 = vld [vmem:[#allocation2 + $0x6d0] sm:$0xff] }
  0x5a   :  { %5446 = vmatmul.mubr.msk.bf16.vlgmr.msra.gmra.mrb[20].mxu0 %vm1576_vm0, %v5754_v27  ;;  %5447 = vmatmul.mubr.msk.bf16.vlgmr.msra.gmra.mrb[20].mxu1 %vm1576_vm0, %v5754_v27 }
  0x5b   :  { %2073 = vmatpush1.bf16.msra.mxu0 %v5204_v46  ;;  %2114 = vmatpush1.bf16.msra.mxu1 %v5206_v47  ;;  %v189_v46 = vld [vmem:[#allocation2 + $0x4a8] sm:$0xff] }
  0x5c   :  { %2074 = vmatprep.subr.bf16.mxu0 %v5333_v48  ;;  %2115 = vmatprep.subr.bf16.mxu1 %v5335_v49  ;;  %v253_v47 = vld [vmem:[#allocation2 + $0x6a8] sm:$0xff]  ;;  %v5220_v48 = vcombine.low %v60_v36, %v124_v37  ;;  %v5222_v49 = vcombine.low %v61_v38, %v125_v39  ;;  %v5361_v36 = vcombine.high %v194_v30, %v258_v31  ;;  %v68_v38 = vld [vmem:[#allocation2 + $0xe0] sm:$0xff] }
  0x5d   :  { %2104 = vmatprep.mubr.bf16.mxu0 %v5711_v0  ;;  %2145 = vmatprep.mubr.bf16.mxu1 %v5711_v0  ;;  %v5351_v51 = vcombine.high %v189_v46, %v253_v47  ;;  %v132_v39 = vld [vmem:[#allocation2 + $0x2e0] sm:$0xff] }
  0x5f   :  { %2075 = vmatpush1.bf16.msra.mxu0 %v5332_v54  ;;  %2116 = vmatpush1.bf16.msra.mxu1 %v5334_v55  ;;  %v63_v54 = vld [vmem:[#allocation2 + $0xb8] sm:$0xff] }
  0x60   :  { %2154 = vmatprep.subr.bf16.mxu0 %v5209_v56  ;;  %2195 = vmatprep.subr.bf16.mxu1 %v5211_v57  ;;  %v127_v55 = vld [vmem:[#allocation2 + $0x2b8] sm:$0xff]  ;;  %v5348_v56 = vcombine.low %v188_v44, %v252_v45  ;;  %v5350_v57 = vcombine.low %v189_v46, %v253_v47  ;;  %v5237_v44 = vcombine.high %v68_v38, %v132_v39  ;;  %v196_v46 = vld [vmem:[#allocation2 + $0x4e0] sm:$0xff] }
  0x61   :  { %v5227_v59 = vcombine.high %v63_v54, %v127_v55  ;;  %v260_v47 = vld [vmem:[#allocation2 + $0x6e0] sm:$0xff] }
  0x62   :  { %5448 = vmatmul.mubr.msk.bf16.vlgmr.msra.gmra.mrb[24].mxu0 %vm1576_vm0, %v5754_v27  ;;  %5449 = vmatmul.mubr.msk.bf16.vlgmr.msra.gmra.mrb[24].mxu1 %vm1576_vm0, %v5754_v27 }
  0x63   :  { %2155 = vmatpush1.bf16.msra.mxu0 %v5208_v62  ;;  %2196 = vmatpush1.bf16.msra.mxu1 %v5210_v63  ;;  %v191_v62 = vld [vmem:[#allocation2 + $0x4b8] sm:$0xff] }
  0x64   :  { %2156 = vmatprep.subr.bf16.mxu0 %v5337_v1  ;;  %2197 = vmatprep.subr.bf16.mxu1 %v5339_v2  ;;  %v255_v63 = vld [vmem:[#allocation2 + $0x6b8] sm:$0xff]  ;;  %v5224_v1 = vcombine.low %v62_v52, %v126_v53  ;;  %v5226_v2 = vcombine.low %v63_v54, %v127_v55  ;;  %v5365_v52 = vcombine.high %v196_v46, %v260_v47  ;;  %v70_v54 = vld [vmem:[#allocation2 + $0xf0] sm:$0xff] }
  0x65   :  { %2186 = vmatprep.mubr.bf16.mxu0 %v5711_v0  ;;  %2227 = vmatprep.mubr.bf16.mxu1 %v5711_v0  ;;  %v5355_v4 = vcombine.high %v191_v62, %v255_v63  ;;  %v134_v55 = vld [vmem:[#allocation2 + $0x2f0] sm:$0xff] }
  0x67   :  { %2157 = vmatpush1.bf16.msra.mxu0 %v5336_v7  ;;  %2198 = vmatpush1.bf16.msra.mxu1 %v5338_v8  ;;  %v65_v7 = vld [vmem:[#allocation2 + $0xc8] sm:$0xff] }
  0x68   :  { %2236 = vmatprep.subr.bf16.mxu0 %v5213_v9  ;;  %2277 = vmatprep.subr.bf16.mxu1 %v5215_v10  ;;  %v129_v8 = vld [vmem:[#allocation2 + $0x2c8] sm:$0xff]  ;;  %v5352_v9 = vcombine.low %v190_v60, %v254_v61  ;;  %v5354_v10 = vcombine.low %v191_v62, %v255_v63  ;;  %v5241_v60 = vcombine.high %v70_v54, %v134_v55  ;;  %v198_v62 = vld [vmem:[#allocation2 + $0x4f0] sm:$0xff] }
  0x69   :  { %v5231_v12 = vcombine.high %v65_v7, %v129_v8  ;;  %v262_v63 = vld [vmem:[#allocation2 + $0x6f0] sm:$0xff] }
  0x6a   :  { %5450 = vmatmul.mubr.msk.bf16.vlgmr.msra.gmra.mrb[28].mxu0 %vm1576_vm0, %v5754_v27  ;;  %5451 = vmatmul.mubr.msk.bf16.vlgmr.msra.gmra.mrb[28].mxu1 %vm1576_vm0, %v5754_v27 }
  0x6b   :  { %2237 = vmatpush1.bf16.msra.mxu0 %v5212_v15  ;;  %2278 = vmatpush1.bf16.msra.mxu1 %v5214_v16  ;;  %v193_v15 = vld [vmem:[#allocation2 + $0x4c8] sm:$0xff] }
  0x6c   :  { %2238 = vmatprep.subr.bf16.mxu0 %v5341_v17  ;;  %2279 = vmatprep.subr.bf16.mxu1 %v5343_v18  ;;  %v257_v16 = vld [vmem:[#allocation2 + $0x6c8] sm:$0xff]  ;;  %v5228_v17 = vcombine.low %v64_v5, %v128_v6  ;;  %v5230_v18 = vcombine.low %v65_v7, %v129_v8  ;;  %v5369_v5 = vcombine.high %v198_v62, %v262_v63  ;;  %v72_v7 = vld [vmem:[#allocation2 + $0x100] sm:$0xff] }
  0x6d   :  { %2268 = vmatprep.mubr.bf16.mxu0 %v5711_v0  ;;  %2309 = vmatprep.mubr.bf16.mxu1 %v5711_v0  ;;  %v5359_v20 = vcombine.high %v193_v15, %v257_v16  ;;  %v136_v8 = vld [vmem:[#allocation2 + $0x300] sm:$0xff] }
  0x6f   :  { %2239 = vmatpush1.bf16.msra.mxu0 %v5340_v23  ;;  %2280 = vmatpush1.bf16.msra.mxu1 %v5342_v24  ;;  %v67_v23 = vld [vmem:[#allocation2 + $0xd8] sm:$0xff] }
  0x70   :  { %2318 = vmatprep.subr.bf16.mxu0 %v5217_v25  ;;  %2359 = vmatprep.subr.bf16.mxu1 %v5219_v26  ;;  %v131_v24 = vld [vmem:[#allocation2 + $0x2d8] sm:$0xff]  ;;  %v5356_v25 = vcombine.low %v192_v13, %v256_v14  ;;  %v5358_v26 = vcombine.low %v193_v15, %v257_v16  ;;  %v5245_v13 = vcombine.high %v72_v7, %v136_v8  ;;  %v200_v15 = vld [vmem:[#allocation2 + $0x500] sm:$0xff] }
  0x71   :  { %v5235_v29 = vcombine.high %v67_v23, %v131_v24  ;;  %v264_v16 = vld [vmem:[#allocation2 + $0x700] sm:$0xff] }
  0x72   :  { %5452 = vmatmul.mubr.msk.bf16.vlgmr.msra.gmra.mrb[32].mxu0 %vm1576_vm0, %v5754_v27  ;;  %5453 = vmatmul.mubr.msk.bf16.vlgmr.msra.gmra.mrb[32].mxu1 %vm1576_vm0, %v5754_v27 }
  0x73   :  { %2319 = vmatpush1.bf16.msra.mxu0 %v5216_v32  ;;  %2360 = vmatpush1.bf16.msra.mxu1 %v5218_v33  ;;  %v195_v32 = vld [vmem:[#allocation2 + $0x4d8] sm:$0xff] }
  0x74   :  { %2320 = vmatprep.subr.bf16.mxu0 %v5345_v34  ;;  %2361 = vmatprep.subr.bf16.mxu1 %v5347_v35  ;;  %v259_v33 = vld [vmem:[#allocation2 + $0x6d8] sm:$0xff]  ;;  %v5232_v34 = vcombine.low %v66_v21, %v130_v22  ;;  %v5234_v35 = vcombine.low %v67_v23, %v131_v24  ;;  %v5373_v21 = vcombine.high %v200_v15, %v264_v16  ;;  %v74_v23 = vld [vmem:[#allocation2 + $0x110] sm:$0xff] }
  0x75   :  { %2350 = vmatprep.mubr.bf16.mxu0 %v5711_v0  ;;  %2391 = vmatprep.mubr.bf16.mxu1 %v5711_v0  ;;  %v5363_v37 = vcombine.high %v195_v32, %v259_v33  ;;  %v138_v24 = vld [vmem:[#allocation2 + $0x310] sm:$0xff] }
  0x77   :  { %2321 = vmatpush1.bf16.msra.mxu0 %v5344_v40  ;;  %2362 = vmatpush1.bf16.msra.mxu1 %v5346_v41  ;;  %v69_v40 = vld [vmem:[#allocation2 + $0xe8] sm:$0xff] }
  0x78   :  { %2400 = vmatprep.subr.bf16.mxu0 %v5221_v42  ;;  %2441 = vmatprep.subr.bf16.mxu1 %v5223_v43  ;;  %v133_v41 = vld [vmem:[#allocation2 + $0x2e8] sm:$0xff]  ;;  %v5360_v42 = vcombine.low %v194_v30, %v258_v31  ;;  %v5362_v43 = vcombine.low %v195_v32, %v259_v33  ;;  %v5249_v30 = vcombine.high %v74_v23, %v138_v24  ;;  %v202_v32 = vld [vmem:[#allocation2 + $0x510] sm:$0xff] }
  0x79   :  { %v5239_v45 = vcombine.high %v69_v40, %v133_v41  ;;  %v266_v33 = vld [vmem:[#allocation2 + $0x710] sm:$0xff] }
  0x7a   :  { %5454 = vmatmul.mubr.msk.bf16.vlgmr.msra.gmra.mrb[36].mxu0 %vm1576_vm0, %v5754_v27  ;;  %5455 = vmatmul.mubr.msk.bf16.vlgmr.msra.gmra.mrb[36].mxu1 %vm1576_vm0, %v5754_v27 }
  0x7b   :  { %2401 = vmatpush1.bf16.msra.mxu0 %v5220_v48  ;;  %2442 = vmatpush1.bf16.msra.mxu1 %v5222_v49  ;;  %v197_v48 = vld [vmem:[#allocation2 + $0x4e8] sm:$0xff] }
  0x7c   :  { %2402 = vmatprep.subr.bf16.mxu0 %v5349_v50  ;;  %2443 = vmatprep.subr.bf16.mxu1 %v5351_v51  ;;  %v261_v49 = vld [vmem:[#allocation2 + $0x6e8] sm:$0xff]  ;;  %v5236_v50 = vcombine.low %v68_v38, %v132_v39  ;;  %v5238_v51 = vcombine.low %v69_v40, %v133_v41  ;;  %v5377_v38 = vcombine.high %v202_v32, %v266_v33  ;;  %v76_v40 = vld [vmem:[#allocation2 + $0x120] sm:$0xff] }
  0x7d   :  { %2432 = vmatprep.mubr.bf16.mxu0 %v5711_v0  ;;  %2473 = vmatprep.mubr.bf16.mxu1 %v5711_v0  ;;  %v5367_v53 = vcombine.high %v197_v48, %v261_v49  ;;  %v140_v41 = vld [vmem:[#allocation2 + $0x320] sm:$0xff] }
  0x7f   :  { %2403 = vmatpush1.bf16.msra.mxu0 %v5348_v56  ;;  %2444 = vmatpush1.bf16.msra.mxu1 %v5350_v57  ;;  %v71_v56 = vld [vmem:[#allocation2 + $0xf8] sm:$0xff] }
  0x80   :  { %2482 = vmatprep.subr.bf16.mxu0 %v5225_v58  ;;  %2523 = vmatprep.subr.bf16.mxu1 %v5227_v59  ;;  %v135_v57 = vld [vmem:[#allocation2 + $0x2f8] sm:$0xff]  ;;  %v5364_v58 = vcombine.low %v196_v46, %v260_v47  ;;  %v5366_v59 = vcombine.low %v197_v48, %v261_v49  ;;  %v5253_v46 = vcombine.high %v76_v40, %v140_v41  ;;  %v204_v48 = vld [vmem:[#allocation2 + $0x520] sm:$0xff] }
  0x81   :  { %v5243_v61 = vcombine.high %v71_v56, %v135_v57  ;;  %v268_v49 = vld [vmem:[#allocation2 + $0x720] sm:$0xff] }
  0x82   :  { %5456 = vmatmul.mubr.msk.bf16.vlgmr.msra.gmra.mrb[40].mxu0 %vm1576_vm0, %v5754_v27  ;;  %5457 = vmatmul.mubr.msk.bf16.vlgmr.msra.gmra.mrb[40].mxu1 %vm1576_vm0, %v5754_v27 }
  0x83   :  { %2483 = vmatpush1.bf16.msra.mxu0 %v5224_v1  ;;  %2524 = vmatpush1.bf16.msra.mxu1 %v5226_v2  ;;  %v199_v1 = vld [vmem:[#allocation2 + $0x4f8] sm:$0xff] }
  0x84   :  { %2484 = vmatprep.subr.bf16.mxu0 %v5353_v3  ;;  %2525 = vmatprep.subr.bf16.mxu1 %v5355_v4  ;;  %v263_v2 = vld [vmem:[#allocation2 + $0x6f8] sm:$0xff]  ;;  %v5240_v3 = vcombine.low %v70_v54, %v134_v55  ;;  %v5242_v4 = vcombine.low %v71_v56, %v135_v57  ;;  %v5381_v54 = vcombine.high %v204_v48, %v268_v49  ;;  %v78_v56 = vld [vmem:[#allocation2 + $0x130] sm:$0xff] }
  0x85   :  { %2514 = vmatprep.mubr.bf16.mxu0 %v5711_v0  ;;  %2555 = vmatprep.mubr.bf16.mxu1 %v5711_v0  ;;  %v5371_v6 = vcombine.high %v199_v1, %v263_v2  ;;  %v142_v57 = vld [vmem:[#allocation2 + $0x330] sm:$0xff] }
  0x87   :  { %2485 = vmatpush1.bf16.msra.mxu0 %v5352_v9  ;;  %2526 = vmatpush1.bf16.msra.mxu1 %v5354_v10  ;;  %v73_v9 = vld [vmem:[#allocation2 + $0x108] sm:$0xff] }
  0x88   :  { %2564 = vmatprep.subr.bf16.mxu0 %v5229_v11  ;;  %2605 = vmatprep.subr.bf16.mxu1 %v5231_v12  ;;  %v137_v10 = vld [vmem:[#allocation2 + $0x308] sm:$0xff]  ;;  %v5368_v11 = vcombine.low %v198_v62, %v262_v63  ;;  %v5370_v12 = vcombine.low %v199_v1, %v263_v2  ;;  %v5257_v62 = vcombine.high %v78_v56, %v142_v57  ;;  %v206_v1 = vld [vmem:[#allocation2 + $0x530] sm:$0xff] }
  0x89   :  { %v5247_v14 = vcombine.high %v73_v9, %v137_v10  ;;  %v270_v2 = vld [vmem:[#allocation2 + $0x730] sm:$0xff] }
  0x8a   :  { %5458 = vmatmul.mubr.msk.bf16.vlgmr.msra.gmra.mrb[44].mxu0 %vm1576_vm0, %v5754_v27  ;;  %5459 = vmatmul.mubr.msk.bf16.vlgmr.msra.gmra.mrb[44].mxu1 %vm1576_vm0, %v5754_v27 }
  0x8b   :  { %2565 = vmatpush1.bf16.msra.mxu0 %v5228_v17  ;;  %2606 = vmatpush1.bf16.msra.mxu1 %v5230_v18  ;;  %v201_v17 = vld [vmem:[#allocation2 + $0x508] sm:$0xff] }
  0x8c   :  { %2566 = vmatprep.subr.bf16.mxu0 %v5357_v19  ;;  %2607 = vmatprep.subr.bf16.mxu1 %v5359_v20  ;;  %v265_v18 = vld [vmem:[#allocation2 + $0x708] sm:$0xff]  ;;  %v5244_v19 = vcombine.low %v72_v7, %v136_v8  ;;  %v5246_v20 = vcombine.low %v73_v9, %v137_v10  ;;  %v80_v8 = vld [vmem:[#allocation2 + $0x140] sm:$0xff] }
  0x8d   :  { %2596 = vmatprep.mubr.bf16.mxu0 %v5711_v0  ;;  %2637 = vmatprep.mubr.bf16.mxu1 %v5711_v0  ;;  %v5375_v22 = vcombine.high %v201_v17, %v265_v18  ;;  %v144_v9 = vld [vmem:[#allocation2 + $0x340] sm:$0xff] }
  0x8e   :  { %v5864_v10 = vld [vmem:[#allocation5] sm:$0xf] }
  0x8f   :  { %2567 = vmatpush1.bf16.msra.mxu0 %v5356_v25  ;;  %2608 = vmatpush1.bf16.msra.mxu1 %v5358_v26  ;;  %v75_v25 = vld [vmem:[#allocation2 + $0x118] sm:$0xff] }
  0x90   :  { %2646 = vmatprep.subr.bf16.mxu0 %v5233_v28  ;;  %2687 = vmatprep.subr.bf16.mxu1 %v5235_v29  ;;  %v139_v26 = vld [vmem:[#allocation2 + $0x318] sm:$0xff]  ;;  %v5372_v28 = vcombine.low %v200_v15, %v264_v16  ;;  %v5374_v29 = vcombine.low %v201_v17, %v265_v18  ;;  %v5261_v15 = vcombine.high %v80_v8, %v144_v9  ;;  %v208_v17 = vld [vmem:[#allocation2 + $0x540] sm:$0xff] }
  0x91   :  { %v5251_v31 = vcombine.high %v75_v25, %v139_v26  ;;  %v272_v18 = vld [vmem:[#allocation2 + $0x740] sm:$0xff] }
  0x92   :  { %5460 = vmatmul.mubr.msk.bf16.vlgmr.msra.gmra.mrb[48].mxu0 %vm1576_vm0, %v5754_v27  ;;  %5461 = vmatmul.mubr.msk.bf16.vlgmr.msra.gmra.mrb[48].mxu1 %vm1576_vm0, %v5754_v27 }
  0x93   :  { %2647 = vmatpush1.bf16.msra.mxu0 %v5232_v34  ;;  %2688 = vmatpush1.bf16.msra.mxu1 %v5234_v35  ;;  %v203_v34 = vld [vmem:[#allocation2 + $0x518] sm:$0xff] }
  0x94   :  { %2648 = vmatprep.subr.bf16.mxu0 %v5361_v36  ;;  %2689 = vmatprep.subr.bf16.mxu1 %v5363_v37  ;;  %v267_v35 = vld [vmem:[#allocation2 + $0x718] sm:$0xff]  ;;  %v5248_v36 = vcombine.low %v74_v23, %v138_v24  ;;  %v5250_v37 = vcombine.low %v75_v25, %v139_v26  ;;  %v5389_v23 = vcombine.high %v208_v17, %v272_v18  ;;  %v82_v25 = vld [vmem:[#allocation2 + $0x150] sm:$0xff] }
  0x95   :  { %2678 = vmatprep.mubr.bf16.mxu0 %v5711_v0  ;;  %2719 = vmatprep.mubr.bf16.mxu1 %v5711_v0  ;;  %v5379_v39 = vcombine.high %v203_v34, %v267_v35  ;;  %v146_v26 = vld [vmem:[#allocation2 + $0x350] sm:$0xff] }
  0x97   :  { %2649 = vmatpush1.bf16.msra.mxu0 %v5360_v42  ;;  %2690 = vmatpush1.bf16.msra.mxu1 %v5362_v43  ;;  %v77_v42 = vld [vmem:[#allocation2 + $0x128] sm:$0xff] }
  0x98   :  { %2728 = vmatprep.subr.bf16.mxu0 %v5237_v44  ;;  %2769 = vmatprep.subr.bf16.mxu1 %v5239_v45  ;;  %v141_v43 = vld [vmem:[#allocation2 + $0x328] sm:$0xff]  ;;  %v5376_v44 = vcombine.low %v202_v32, %v266_v33  ;;  %v5378_v45 = vcombine.low %v203_v34, %v267_v35  ;;  %v5265_v32 = vcombine.high %v82_v25, %v146_v26  ;;  %v210_v34 = vld [vmem:[#allocation2 + $0x550] sm:$0xff] }
  0x99   :  { %v5255_v47 = vcombine.high %v77_v42, %v141_v43  ;;  %v274_v35 = vld [vmem:[#allocation2 + $0x750] sm:$0xff] }
  0x9a   :  { %5462 = vmatmul.mubr.msk.bf16.vlgmr.msra.gmra.mrb[52].mxu0 %vm1576_vm0, %v5754_v27  ;;  %5463 = vmatmul.mubr.msk.bf16.vlgmr.msra.gmra.mrb[52].mxu1 %vm1576_vm0, %v5754_v27 }
  0x9b   :  { %2729 = vmatpush1.bf16.msra.mxu0 %v5236_v50  ;;  %2770 = vmatpush1.bf16.msra.mxu1 %v5238_v51  ;;  %v205_v50 = vld [vmem:[#allocation2 + $0x528] sm:$0xff] }
  0x9c   :  { %2730 = vmatprep.subr.bf16.mxu0 %v5365_v52  ;;  %2771 = vmatprep.subr.bf16.mxu1 %v5367_v53  ;;  %v269_v51 = vld [vmem:[#allocation2 + $0x728] sm:$0xff]  ;;  %v5252_v52 = vcombine.low %v76_v40, %v140_v41  ;;  %v5254_v53 = vcombine.low %v77_v42, %v141_v43  ;;  %v5393_v40 = vcombine.high %v210_v34, %v274_v35  ;;  %v84_v42 = vld [vmem:[#allocation2 + $0x160] sm:$0xff] }
  0x9d   :  { %2760 = vmatprep.mubr.bf16.mxu0 %v5711_v0  ;;  %2801 = vmatprep.mubr.bf16.mxu1 %v5711_v0  ;;  %v5383_v55 = vcombine.high %v205_v50, %v269_v51  ;;  %v148_v43 = vld [vmem:[#allocation2 + $0x360] sm:$0xff] }
  0x9f   :  { %2731 = vmatpush1.bf16.msra.mxu0 %v5364_v58  ;;  %2772 = vmatpush1.bf16.msra.mxu1 %v5366_v59  ;;  %v79_v58 = vld [vmem:[#allocation2 + $0x138] sm:$0xff] }
  0xa0   :  { %2810 = vmatprep.subr.bf16.mxu0 %v5241_v60  ;;  %2851 = vmatprep.subr.bf16.mxu1 %v5243_v61  ;;  %v143_v59 = vld [vmem:[#allocation2 + $0x338] sm:$0xff]  ;;  %v5380_v60 = vcombine.low %v204_v48, %v268_v49  ;;  %v5382_v61 = vcombine.low %v205_v50, %v269_v51  ;;  %v5269_v48 = vcombine.high %v84_v42, %v148_v43  ;;  %v212_v50 = vld [vmem:[#allocation2 + $0x560] sm:$0xff] }
  0xa1   :  { %v5259_v63 = vcombine.high %v79_v58, %v143_v59  ;;  %v276_v51 = vld [vmem:[#allocation2 + $0x760] sm:$0xff] }
  0xa2   :  { %5464 = vmatmul.mubr.msk.bf16.vlgmr.msra.gmra.mrb[56].mxu0 %vm1576_vm0, %v5754_v27  ;;  %5465 = vmatmul.mubr.msk.bf16.vlgmr.msra.gmra.mrb[56].mxu1 %vm1576_vm0, %v5754_v27 }
  0xa3   :  { %2811 = vmatpush1.bf16.msra.mxu0 %v5240_v3  ;;  %2852 = vmatpush1.bf16.msra.mxu1 %v5242_v4  ;;  %v207_v3 = vld [vmem:[#allocation2 + $0x538] sm:$0xff] }
  0xa4   :  { %2812 = vmatprep.subr.bf16.mxu0 %v5369_v5  ;;  %2853 = vmatprep.subr.bf16.mxu1 %v5371_v6  ;;  %v271_v4 = vld [vmem:[#allocation2 + $0x738] sm:$0xff]  ;;  %v5256_v5 = vcombine.low %v78_v56, %v142_v57  ;;  %v5385_v6 = vcombine.high %v206_v1, %v270_v2  ;;  %v5397_v56 = vcombine.high %v212_v50, %v276_v51 }
  0xa5   :  { %2842 = vmatprep.mubr.bf16.mxu0 %v5711_v0  ;;  %2883 = vmatprep.mubr.bf16.mxu1 %v5711_v0  ;;  %v5387_v7 = vcombine.high %v207_v3, %v271_v4 }
  0xa7   :  { %2813 = vmatpush1.bf16.msra.mxu0 %v5368_v11  ;;  %2854 = vmatpush1.bf16.msra.mxu1 %v5370_v12  ;;  %v81_v11 = vld [vmem:[#allocation2 + $0x148] sm:$0xff] }
  0xa8   :  { %2892 = vmatprep.subr.bf16.mxu0 %v5245_v13  ;;  %2933 = vmatprep.subr.bf16.mxu1 %v5247_v14  ;;  %v145_v12 = vld [vmem:[#allocation2 + $0x348] sm:$0xff]  ;;  %v5384_v13 = vcombine.low %v206_v1, %v270_v2  ;;  %v5386_v14 = vcombine.low %v207_v3, %v271_v4  ;;  %v214_v3 = vld [vmem:[#allocation2 + $0x570] sm:$0xff] }
  0xa9   :  { %v5263_v16 = vcombine.high %v81_v11, %v145_v12  ;;  %v278_v4 = vld [vmem:[#allocation2 + $0x770] sm:$0xff] }
  0xaa   :  { %5466 = vmatmul.mubr.msk.bf16.vlgmr.msra.gmra.mrb[60].mxu0 %vm1576_vm0, %v5754_v27  ;;  %5467 = vmatmul.mubr.msk.bf16.vlgmr.msra.gmra.mrb[60].mxu1 %vm1576_vm0, %v5754_v27 }
  0xab   :  { %2893 = vmatpush1.bf16.msra.mxu0 %v5244_v19  ;;  %2934 = vmatpush1.bf16.msra.mxu1 %v5246_v20  ;;  %v209_v19 = vld [vmem:[#allocation2 + $0x548] sm:$0xff] }
  0xac   :  { %2894 = vmatprep.subr.bf16.mxu0 %v5373_v21  ;;  %2935 = vmatprep.subr.bf16.mxu1 %v5375_v22  ;;  %v273_v20 = vld [vmem:[#allocation2 + $0x748] sm:$0xff]  ;;  %v5260_v21 = vcombine.low %v80_v8, %v144_v9  ;;  %v5262_v22 = vcombine.low %v81_v11, %v145_v12  ;;  %v5401_v8 = vcombine.high %v214_v3, %v278_v4  ;;  %v88_v11 = vld [vmem:[#allocation2 + $0x180] sm:$0xff] }
  0xad   :  { %2924 = vmatprep.mubr.bf16.mxu0 %v5711_v0  ;;  %2965 = vmatprep.mubr.bf16.mxu1 %v5711_v0  ;;  %v5391_v24 = vcombine.high %v209_v19, %v273_v20  ;;  %v152_v12 = vld [vmem:[#allocation2 + $0x380] sm:$0xff] }
  0xaf   :  { %2895 = vmatpush1.bf16.msra.mxu0 %v5372_v28  ;;  %2936 = vmatpush1.bf16.msra.mxu1 %v5374_v29  ;;  %v83_v28 = vld [vmem:[#allocation2 + $0x158] sm:$0xff] }
  0xb0   :  { %2974 = vmatprep.subr.bf16.mxu0 %v5249_v30  ;;  %3015 = vmatprep.subr.bf16.mxu1 %v5251_v31  ;;  %v147_v29 = vld [vmem:[#allocation2 + $0x358] sm:$0xff]  ;;  %v5388_v30 = vcombine.low %v208_v17, %v272_v18  ;;  %v5390_v31 = vcombine.low %v209_v19, %v273_v20  ;;  %v5277_v17 = vcombine.high %v88_v11, %v152_v12  ;;  %v216_v19 = vld [vmem:[#allocation2 + $0x580] sm:$0xff] }
  0xb1   :  { %v5267_v33 = vcombine.high %v83_v28, %v147_v29  ;;  %v280_v20 = vld [vmem:[#allocation2 + $0x780] sm:$0xff] }
  0xb2   :  { %5468 = vmatmul.mubr.msk.bf16.vlgmr.msra.gmra.mrb[64].mxu0 %vm1576_vm0, %v5754_v27  ;;  %5469 = vmatmul.mubr.msk.bf16.vlgmr.msra.gmra.mrb[64].mxu1 %vm1576_vm0, %v5754_v27 }
  0xb3   :  { %2975 = vmatpush1.bf16.msra.mxu0 %v5248_v36  ;;  %3016 = vmatpush1.bf16.msra.mxu1 %v5250_v37  ;;  %v211_v36 = vld [vmem:[#allocation2 + $0x558] sm:$0xff] }
  0xb4   :  { %2976 = vmatprep.subr.bf16.mxu0 %v5377_v38  ;;  %3017 = vmatprep.subr.bf16.mxu1 %v5379_v39  ;;  %v275_v37 = vld [vmem:[#allocation2 + $0x758] sm:$0xff]  ;;  %v5264_v38 = vcombine.low %v82_v25, %v146_v26  ;;  %v5266_v39 = vcombine.low %v83_v28, %v147_v29  ;;  %v5405_v25 = vcombine.high %v216_v19, %v280_v20  ;;  %v90_v28 = vld [vmem:[#allocation2 + $0x190] sm:$0xff] }
  0xb5   :  { %3006 = vmatprep.mubr.bf16.mxu0 %v5711_v0  ;;  %3047 = vmatprep.mubr.bf16.mxu1 %v5711_v0  ;;  %v5395_v41 = vcombine.high %v211_v36, %v275_v37  ;;  %v154_v29 = vld [vmem:[#allocation2 + $0x390] sm:$0xff] }
  0xb7   :  { %2977 = vmatpush1.bf16.msra.mxu0 %v5376_v44  ;;  %3018 = vmatpush1.bf16.msra.mxu1 %v5378_v45  ;;  %v85_v44 = vld [vmem:[#allocation2 + $0x168] sm:$0xff] }
  0xb8   :  { %3056 = vmatprep.subr.bf16.mxu0 %v5253_v46  ;;  %3097 = vmatprep.subr.bf16.mxu1 %v5255_v47  ;;  %v149_v45 = vld [vmem:[#allocation2 + $0x368] sm:$0xff]  ;;  %v5392_v46 = vcombine.low %v210_v34, %v274_v35  ;;  %v5394_v47 = vcombine.low %v211_v36, %v275_v37  ;;  %v5281_v34 = vcombine.high %v90_v28, %v154_v29  ;;  %v218_v36 = vld [vmem:[#allocation2 + $0x590] sm:$0xff] }
  0xb9   :  { %v5271_v49 = vcombine.high %v85_v44, %v149_v45  ;;  %v282_v37 = vld [vmem:[#allocation2 + $0x790] sm:$0xff] }
  0xba   :  { %5470 = vmatmul.mubr.msk.bf16.vlgmr.msra.gmra.mrb[68].mxu0 %vm1576_vm0, %v5754_v27  ;;  %5471 = vmatmul.mubr.msk.bf16.vlgmr.msra.gmra.mrb[68].mxu1 %vm1576_vm0, %v5754_v27  ;;  %v5258_v27 = vcombine.low %v79_v58, %v143_v59  ;;  %v86_v58 = vld [vmem:[#allocation2 + $0x170] sm:$0xff] }
  0xbb   :  { %3057 = vmatpush1.bf16.msra.mxu0 %v5252_v52  ;;  %3098 = vmatpush1.bf16.msra.mxu1 %v5254_v53  ;;  %v213_v52 = vld [vmem:[#allocation2 + $0x568] sm:$0xff]  ;;  %v150_v59 = vld [vmem:[#allocation2 + $0x370] sm:$0xff] }
  0xbc   :  { %3058 = vmatprep.subr.bf16.mxu0 %v5381_v54  ;;  %3099 = vmatprep.subr.bf16.mxu1 %v5383_v55  ;;  %v277_v53 = vld [vmem:[#allocation2 + $0x768] sm:$0xff]  ;;  %v5268_v54 = vcombine.low %v84_v42, %v148_v43  ;;  %v5270_v55 = vcombine.low %v85_v44, %v149_v45  ;;  %v5273_v1 = vcombine.high %v86_v58, %v150_v59  ;;  %v92_v44 = vld [vmem:[#allocation2 + $0x1a0] sm:$0xff] }
  0xbd   :  { %3088 = vmatprep.mubr.bf16.mxu0 %v5711_v0  ;;  %3129 = vmatprep.mubr.bf16.mxu1 %v5711_v0  ;;  %v5399_v57 = vcombine.high %v213_v52, %v277_v53  ;;  %v5409_v42 = vcombine.high %v218_v36, %v282_v37  ;;  %v156_v45 = vld [vmem:[#allocation2 + $0x3a0] sm:$0xff] }
  0xbf   :  { %3059 = vmatpush1.bf16.msra.mxu0 %v5380_v60  ;;  %3100 = vmatpush1.bf16.msra.mxu1 %v5382_v61  ;;  %v87_v60 = vld [vmem:[#allocation2 + $0x178] sm:$0xff] }
  0xc0   :  { %3138 = vmatprep.subr.bf16.mxu0 %v5257_v62  ;;  %3179 = vmatprep.subr.bf16.mxu1 %v5259_v63  ;;  %v151_v61 = vld [vmem:[#allocation2 + $0x378] sm:$0xff]  ;;  %v5396_v62 = vcombine.low %v212_v50, %v276_v51  ;;  %v5398_v63 = vcombine.low %v213_v52, %v277_v53  ;;  %v5285_v50 = vcombine.high %v92_v44, %v156_v45  ;;  %v220_v52 = vld [vmem:[#allocation2 + $0x5a0] sm:$0xff] }
  0xc1   :  { %v5275_v2 = vcombine.high %v87_v60, %v151_v61  ;;  %v284_v53 = vld [vmem:[#allocation2 + $0x7a0] sm:$0xff] }
  0xc2   :  { %5472 = vmatmul.mubr.msk.bf16.vlgmr.msra.gmra.mrb[72].mxu0 %vm1576_vm0, %v5864_v10  ;;  %5473 = vmatmul.mubr.msk.bf16.vlgmr.msra.gmra.mrb[72].mxu1 %vm1576_vm0, %v5864_v10 }
  0xc3   :  { %3139 = vmatpush1.bf16.msra.mxu0 %v5256_v5  ;;  %3180 = vmatpush1.bf16.msra.mxu1 %v5258_v27  ;;  %v215_v5 = vld [vmem:[#allocation2 + $0x578] sm:$0xff] }
  0xc4   :  { %3140 = vmatprep.subr.bf16.mxu0 %v5385_v6  ;;  %3181 = vmatprep.subr.bf16.mxu1 %v5387_v7  ;;  %v279_v27 = vld [vmem:[#allocation2 + $0x778] sm:$0xff]  ;;  %v5272_v6 = vcombine.low %v86_v58, %v150_v59  ;;  %v5274_v7 = vcombine.low %v87_v60, %v151_v61  ;;  %v5413_v58 = vcombine.high %v220_v52, %v284_v53  ;;  %v94_v60 = vld [vmem:[#allocation2 + $0x1b0] sm:$0xff] }
  0xc5   :  { %3170 = vmatprep.mubr.bf16.mxu0 %v5711_v0  ;;  %3211 = vmatprep.mubr.bf16.mxu1 %v5711_v0  ;;  %v5403_v9 = vcombine.high %v215_v5, %v279_v27  ;;  %v158_v61 = vld [vmem:[#allocation2 + $0x3b0] sm:$0xff] }
  0xc7   :  { %3141 = vmatpush1.bf16.msra.mxu0 %v5384_v13  ;;  %3182 = vmatpush1.bf16.msra.mxu1 %v5386_v14  ;;  %v89_v13 = vld [vmem:[#allocation2 + $0x188] sm:$0xff] }
  0xc8   :  { %3220 = vmatprep.subr.bf16.mxu0 %v5261_v15  ;;  %3261 = vmatprep.subr.bf16.mxu1 %v5263_v16  ;;  %v153_v14 = vld [vmem:[#allocation2 + $0x388] sm:$0xff]  ;;  %v5400_v15 = vcombine.low %v214_v3, %v278_v4  ;;  %v5402_v16 = vcombine.low %v215_v5, %v279_v27  ;;  %v5289_v3 = vcombine.high %v94_v60, %v158_v61  ;;  %v222_v5 = vld [vmem:[#allocation2 + $0x5b0] sm:$0xff] }
  0xc9   :  { %v5279_v18 = vcombine.high %v89_v13, %v153_v14  ;;  %v286_v27 = vld [vmem:[#allocation2 + $0x7b0] sm:$0xff] }
  0xca   :  { %5474 = vmatmul.mubr.msk.bf16.vlgmr.msra.gmra.mrb[76].mxu0 %vm1576_vm0, %v5864_v10  ;;  %5475 = vmatmul.mubr.msk.bf16.vlgmr.msra.gmra.mrb[76].mxu1 %vm1576_vm0, %v5864_v10 }
  0xcb   :  { %3221 = vmatpush1.bf16.msra.mxu0 %v5260_v21  ;;  %3262 = vmatpush1.bf16.msra.mxu1 %v5262_v22  ;;  %v217_v21 = vld [vmem:[#allocation2 + $0x588] sm:$0xff] }
  0xcc   :  { %3222 = vmatprep.subr.bf16.mxu0 %v5389_v23  ;;  %3263 = vmatprep.subr.bf16.mxu1 %v5391_v24  ;;  %v281_v22 = vld [vmem:[#allocation2 + $0x788] sm:$0xff]  ;;  %v5276_v23 = vcombine.low %v88_v11, %v152_v12  ;;  %v5278_v24 = vcombine.low %v89_v13, %v153_v14  ;;  %v5417_v11 = vcombine.high %v222_v5, %v286_v27  ;;  %v96_v13 = vld [vmem:[#allocation2 + $0x1c0] sm:$0xff] }
  0xcd   :  { %3252 = vmatprep.mubr.bf16.mxu0 %v5711_v0  ;;  %3293 = vmatprep.mubr.bf16.mxu1 %v5711_v0  ;;  %v5407_v26 = vcombine.high %v217_v21, %v281_v22  ;;  %v160_v14 = vld [vmem:[#allocation2 + $0x3c0] sm:$0xff] }
  0xcf   :  { %3223 = vmatpush1.bf16.msra.mxu0 %v5388_v30  ;;  %3264 = vmatpush1.bf16.msra.mxu1 %v5390_v31  ;;  %v91_v30 = vld [vmem:[#allocation2 + $0x198] sm:$0xff] }
  0xd0   :  { %3302 = vmatprep.subr.bf16.mxu0 %v5265_v32  ;;  %3343 = vmatprep.subr.bf16.mxu1 %v5267_v33  ;;  %v155_v31 = vld [vmem:[#allocation2 + $0x398] sm:$0xff]  ;;  %v5404_v32 = vcombine.low %v216_v19, %v280_v20  ;;  %v5406_v33 = vcombine.low %v217_v21, %v281_v22  ;;  %v5293_v19 = vcombine.high %v96_v13, %v160_v14  ;;  %v5918_v20 = vld [vmem:[#allocation2 + $0x5c0] sm:$0xff] }
  0xd1   :  { %v5283_v35 = vcombine.high %v91_v30, %v155_v31 }
  0xd2   :  { %5476 = vmatmul.mubr.msk.bf16.vlgmr.msra.gmra.mrb[80].mxu0 %vm1576_vm0, %v5864_v10  ;;  %5477 = vmatmul.mubr.msk.bf16.vlgmr.msra.gmra.mrb[80].mxu1 %vm1576_vm0, %v5864_v10 }
  0xd3   :  { %3303 = vmatpush1.bf16.msra.mxu0 %v5264_v38  ;;  %3344 = vmatpush1.bf16.msra.mxu1 %v5266_v39  ;;  %v219_v38 = vld [vmem:[#allocation2 + $0x598] sm:$0xff] }
  0xd4   :  { %3304 = vmatprep.subr.bf16.mxu0 %v5393_v40  ;;  %3345 = vmatprep.subr.bf16.mxu1 %v5395_v41  ;;  %v283_v39 = vld [vmem:[#allocation2 + $0x798] sm:$0xff]  ;;  %v5280_v40 = vcombine.low %v90_v28, %v154_v29  ;;  %v5282_v41 = vcombine.low %v91_v30, %v155_v31  ;;  %v5292_v30 = vcombine.low %v96_v13, %v160_v14 }
  0xd5   :  { %3334 = vmatprep.mubr.bf16.mxu0 %v5711_v0  ;;  %3375 = vmatprep.mubr.bf16.mxu1 %v5711_v0  ;;  %v5411_v43 = vcombine.high %v219_v38, %v283_v39 }
  0xd7   :  { %3305 = vmatpush1.bf16.msra.mxu0 %v5392_v46  ;;  %3346 = vmatpush1.bf16.msra.mxu1 %v5394_v47  ;;  %v93_v46 = vld [vmem:[#allocation2 + $0x1a8] sm:$0xff] }
  0xd8   :  { %3384 = vmatprep.subr.bf16.mxu0 %v5269_v48  ;;  %3425 = vmatprep.subr.bf16.mxu1 %v5271_v49  ;;  %v157_v47 = vld [vmem:[#allocation2 + $0x3a8] sm:$0xff]  ;;  %v5408_v48 = vcombine.low %v218_v36, %v282_v37  ;;  %v5410_v49 = vcombine.low %v219_v38, %v283_v39  ;;  %v5932_v39 = vld [vmem:[#allocation2 + $0x1d0] sm:$0xff] }
  0xd9   :  { %v5287_v51 = vcombine.high %v93_v46, %v157_v47 }
  0xda   :  { %5478 = vmatmul.mubr.msk.bf16.vlgmr.msra.gmra.mrb[84].mxu0 %vm1576_vm0, %v5864_v10  ;;  %5479 = vmatmul.mubr.msk.bf16.vlgmr.msra.gmra.mrb[84].mxu1 %vm1576_vm0, %v5864_v10 }
  0xdb   :  { %3385 = vmatpush1.bf16.msra.mxu0 %v5268_v54  ;;  %3426 = vmatpush1.bf16.msra.mxu1 %v5270_v55  ;;  %v221_v54 = vld [vmem:[#allocation2 + $0x5a8] sm:$0xff] }
  0xdc   :  { %3386 = vmatprep.subr.bf16.mxu0 %v5397_v56  ;;  %3427 = vmatprep.subr.bf16.mxu1 %v5399_v57  ;;  %v285_v55 = vld [vmem:[#allocation2 + $0x7a8] sm:$0xff]  ;;  %v5284_v56 = vcombine.low %v92_v44, %v156_v45  ;;  %v5286_v57 = vcombine.low %v93_v46, %v157_v47  ;;  %v162_v45 = vld [vmem:[#allocation2 + $0x3d0] sm:$0xff] }
  0xdd   :  { %3416 = vmatprep.mubr.bf16.mxu0 %v5711_v0  ;;  %3457 = vmatprep.mubr.bf16.mxu1 %v5711_v0  ;;  %v5415_v59 = vcombine.high %v221_v54, %v285_v55 }
  0xdf   :  { %3387 = vmatpush1.bf16.msra.mxu0 %v5396_v62  ;;  %3428 = vmatpush1.bf16.msra.mxu1 %v5398_v63  ;;  %v95_v62 = vld [vmem:[#allocation2 + $0x1b8] sm:$0xff] }
  0xe0   :  { %3466 = vmatprep.subr.bf16.mxu0 %v5273_v1  ;;  %3507 = vmatprep.subr.bf16.mxu1 %v5275_v2  ;;  %v159_v63 = vld [vmem:[#allocation2 + $0x3b8] sm:$0xff]  ;;  %v5412_v1 = vcombine.low %v220_v52, %v284_v53  ;;  %v5414_v2 = vcombine.low %v221_v54, %v285_v55  ;;  %v5297_v54 = vcombine.high %v5932_v39, %v162_v45  ;;  %v5943_v55 = vld [vmem:[#allocation2 + $0x5d0] sm:$0xff] }
  0xe1   :  { %v5291_v4 = vcombine.high %v95_v62, %v159_v63 }
  0xe2   :  { %5480 = vmatmul.mubr.msk.bf16.vlgmr.msra.gmra.mrb[88].mxu0 %vm1576_vm0, %v5864_v10  ;;  %5481 = vmatmul.mubr.msk.bf16.vlgmr.msra.gmra.mrb[88].mxu1 %vm1576_vm0, %v5864_v10 }
  0xe3   :  { %3467 = vmatpush1.bf16.msra.mxu0 %v5272_v6  ;;  %3508 = vmatpush1.bf16.msra.mxu1 %v5274_v7  ;;  %v223_v6 = vld [vmem:[#allocation2 + $0x5b8] sm:$0xff] }
  0xe4   :  { %3468 = vmatprep.subr.bf16.mxu0 %v5401_v8  ;;  %3509 = vmatprep.subr.bf16.mxu1 %v5403_v9  ;;  %v287_v7 = vld [vmem:[#allocation2 + $0x7b8] sm:$0xff]  ;;  %v5288_v8 = vcombine.low %v94_v60, %v158_v61  ;;  %v5290_v9 = vcombine.low %v95_v62, %v159_v63 }
  0xe5   :  { %3498 = vmatprep.mubr.bf16.mxu0 %v5711_v0  ;;  %3539 = vmatprep.mubr.bf16.mxu1 %v5711_v0  ;;  %v5419_v12 = vcombine.high %v223_v6, %v287_v7  ;;  %v5950_v60 = vld [vmem:[#allocation2 + $0x7d8] sm:$0xff] }
  0xe7   :  { %3469 = vmatpush1.bf16.msra.mxu0 %v5400_v15  ;;  %3510 = vmatpush1.bf16.msra.mxu1 %v5402_v16  ;;  %v97_v15 = vld [vmem:[#allocation2 + $0x1c8] sm:$0xff] }
  0xe8   :  { %3548 = vmatprep.subr.bf16.mxu0 %v5277_v17  ;;  %3589 = vmatprep.subr.bf16.mxu1 %v5279_v18  ;;  %v161_v16 = vld [vmem:[#allocation2 + $0x3c8] sm:$0xff]  ;;  %v5416_v17 = vcombine.low %v222_v5, %v286_v27  ;;  %v5418_v18 = vcombine.low %v223_v6, %v287_v7 }
  0xe9   :  { %v5295_v22 = vcombine.high %v97_v15, %v161_v16  ;;  %v5294_v31 = vcombine.low %v97_v15, %v161_v16  ;;  %v164_v16 = vld [vmem:[#allocation2 + $0x3e0] sm:$0xff] }
  0xea   :  { %5482 = vmatmul.mubr.msk.bf16.vlgmr.msra.gmra.mrb[92].mxu0 %vm1576_vm0, %v5864_v10  ;;  %5483 = vmatmul.mubr.msk.bf16.vlgmr.msra.gmra.mrb[92].mxu1 %vm1576_vm0, %v5864_v10 }
  0xeb   :  { %3549 = vmatpush1.bf16.msra.mxu0 %v5276_v23  ;;  %3590 = vmatpush1.bf16.msra.mxu1 %v5278_v24  ;;  %v5921_v23 = vld [vmem:[#allocation2 + $0x7c0] sm:$0xff]  ;;  %v5923_v24 = vld [vmem:[#allocation2 + $0x5c8] sm:$0xff] }
  0xec   :  { %3550 = vmatprep.subr.bf16.mxu0 %v5405_v25  ;;  %3591 = vmatprep.subr.bf16.mxu1 %v5407_v26  ;;  %v5925_v25 = vld [vmem:[#allocation2 + $0x7c8] sm:$0xff]  ;;  %v5421_v37 = vcombine.high %v5918_v20, %v5921_v23 }
  0xed   :  { %3580 = vmatprep.mubr.bf16.mxu0 %v5711_v0  ;;  %3621 = vmatprep.mubr.bf16.mxu1 %v5711_v0  ;;  %v5423_v38 = vcombine.high %v5923_v24, %v5925_v25  ;;  %v5422_v53 = vcombine.low %v5923_v24, %v5925_v25 }
  0xef   :  { %3551 = vmatpush1.bf16.msra.mxu0 %v5404_v32  ;;  %3592 = vmatpush1.bf16.msra.mxu1 %v5406_v33 }
  0xf0   :  { %3630 = vmatprep.subr.bf16.mxu0 %v5281_v34  ;;  %3671 = vmatprep.subr.bf16.mxu1 %v5283_v35 }
  0xf2   :  { %5484 = vmatmul.mubr.msk.bf16.vlgmr.msra.gmra.mrb[96].mxu0 %vm1576_vm0, %v5864_v10  ;;  %5485 = vmatmul.mubr.msk.bf16.vlgmr.msra.gmra.mrb[96].mxu1 %vm1576_vm0, %v5864_v10 }
  0xf3   :  { %3631 = vmatpush1.bf16.msra.mxu0 %v5280_v40  ;;  %3672 = vmatpush1.bf16.msra.mxu1 %v5282_v41 }
  0xf4   :  { %3632 = vmatprep.subr.bf16.mxu0 %v5409_v42  ;;  %3673 = vmatprep.subr.bf16.mxu1 %v5411_v43 }
  0xf5   :  { %3662 = vmatprep.mubr.bf16.mxu0 %v5711_v0  ;;  %3703 = vmatprep.mubr.bf16.mxu1 %v5711_v0 }
  0xf7   :  { %3633 = vmatpush1.bf16.msra.mxu0 %v5408_v48  ;;  %3674 = vmatpush1.bf16.msra.mxu1 %v5410_v49  ;;  %v99_v48 = vld [vmem:[#allocation2 + $0x1d8] sm:$0xff] }
  0xf8   :  { %3712 = vmatprep.subr.bf16.mxu0 %v5285_v50  ;;  %3753 = vmatprep.subr.bf16.mxu1 %v5287_v51  ;;  %v163_v49 = vld [vmem:[#allocation2 + $0x3d8] sm:$0xff]  ;;  %v5420_v51 = vcombine.low %v5918_v20, %v5921_v23  ;;  %v165_v20 = vld [vmem:[#allocation2 + $0x3e8] sm:$0xff] }
  0xfa   :  { %5486 = vmatmul.mubr.msk.bf16.vlgmr.msra.gmra.mrb[100].mxu0 %vm1576_vm0, %v5864_v10  ;;  %5487 = vmatmul.mubr.msk.bf16.vlgmr.msra.gmra.mrb[100].mxu1 %vm1576_vm0, %v5864_v10 }
  0xfb   :  { %3713 = vmatpush1.bf16.msra.mxu0 %v5284_v56  ;;  %3754 = vmatpush1.bf16.msra.mxu1 %v5286_v57  ;;  %v5299_v57 = vcombine.high %v99_v48, %v163_v49 }
  0xfc   :  { %3714 = vmatprep.subr.bf16.mxu0 %v5413_v58  ;;  %3755 = vmatprep.subr.bf16.mxu1 %v5415_v59  ;;  %v5946_v58 = vld [vmem:[#allocation2 + $0x7d0] sm:$0xff]  ;;  %v5948_v59 = vld [vmem:[#allocation2 + $0x5d8] sm:$0xff] }
  0xfd   :  { %3744 = vmatprep.mubr.bf16.mxu0 %v5711_v0  ;;  %3785 = vmatprep.mubr.bf16.mxu1 %v5711_v0  ;;  %v5425_v7 = vcombine.high %v5943_v55, %v5946_v58  ;;  %v5426_v24 = vcombine.low %v5948_v59, %v5950_v60 }
  0xff   :  { %3715 = vmatpush1.bf16.msra.mxu0 %v5412_v1  ;;  %3756 = vmatpush1.bf16.msra.mxu1 %v5414_v2  ;;  %v5296_v1 = vcombine.low %v5932_v39, %v162_v45  ;;  %v5298_v2 = vcombine.low %v99_v48, %v163_v49  ;;  %v5984_v45 = vld [vmem:[#allocation2 + $0x1f0] sm:$0xff] }
 0x100   :  { %3794 = vmatprep.subr.bf16.mxu0 %v5289_v3  ;;  %3835 = vmatprep.subr.bf16.mxu1 %v5291_v4 }
 0x102   :  { %5488 = vmatmul.mubr.msk.bf16.vlgmr.msra.gmra.mrb[104].mxu0 %vm1576_vm0, %v5864_v10  ;;  %5489 = vmatmul.mubr.msk.bf16.vlgmr.msra.gmra.mrb[104].mxu1 %vm1576_vm0, %v5864_v10 }
 0x103   :  { %3795 = vmatpush1.bf16.msra.mxu0 %v5288_v8  ;;  %3836 = vmatpush1.bf16.msra.mxu1 %v5290_v9  ;;  %v5427_v8 = vcombine.high %v5948_v59, %v5950_v60  ;;  %v5958_v9 = vld [vmem:[#allocation2 + $0x1e0] sm:$0xff] }
 0x104   :  { %3796 = vmatprep.subr.bf16.mxu0 %v5417_v11  ;;  %3837 = vmatprep.subr.bf16.mxu1 %v5419_v12  ;;  %v5301_v25 = vcombine.high %v5958_v9, %v164_v16 }
 0x105   :  { %v1614_v21 = vpop.f32.mrb[0].mxu0  ;;  %3826 = vmatprep.mubr.bf16.mxu0 %v5711_v0  ;;  %v1655_v28 = vpop.f32.mrb[0].mxu1  ;;  %3867 = vmatprep.mubr.bf16.mxu1 %v5711_v0 }
 0x106   :  { %vm4204_vm1 = vcmp.ge.f32.partialorder %v1614_v21, 0.0  ;;  %v4332_v26 = vmul.f32 0.2, %v1614_v21  ;;  %v1616_v29 = vpop.f32.mrb[1].mxu0  ;;  %vm4206_vm2 = vcmp.ge.f32.partialorder %v1655_v28, 0.0  ;;  %v1657_v35 = vpop.f32.mrb[1].mxu1 }
 0x107   :  { %v4334_v32 = vmul.f32 0.2, %v1655_v28  ;;  %vm4205_vm3 = vcmp.ge.f32.partialorder %v1616_v29, 0.0  ;;  %v4333_v33 = vmul.f32 0.2, %v1616_v29  ;;  %3797 = vmatpush1.bf16.msra.mxu0 %v5416_v17  ;;  %v1618_v36 = vpop.f32.mrb[2].mxu0  ;;  %3838 = vmatpush1.bf16.msra.mxu1 %v5418_v18 }
 0x108   :  { %v4460_v34 = vsel %vm4204_vm1, %v1614_v21, %v4332_v26  ;;  %3876 = vmatprep.subr.bf16.mxu0 %v5293_v19  ;;  %vm4207_vm4 = vcmp.ge.f32.partialorder %v1657_v35, 0.0  ;;  %v4335_v42 = vmul.f32 0.2, %v1657_v35  ;;  %v1659_v43 = vpop.f32.mrb[2].mxu1  ;;  %v1619_v44 = vpop.f32.mrb[3].mxu0  ;;  %3917 = vmatprep.subr.bf16.mxu1 %v5295_v22  ;;  %v101_v19 = vld [vmem:[#allocation2 + $0x1e8] sm:$0xff]  ;;  %v5424_v22 = vcombine.low %v5943_v55, %v5946_v58 }
 0x109   :  { %v4462_v40 = vsel %vm4206_vm2, %v1655_v28, %v4334_v32  ;;  %v4461_v41 = vsel %vm4205_vm3, %v1616_v29, %v4333_v33  ;;  %v1660_v47 = vpop.f32.mrb[3].mxu1  ;;  %v5969_v26 = vld [vmem:[#allocation2 + $0x5e0] sm:$0xff]  ;;  %v5303_v29 = vcombine.high %v101_v19, %v165_v20  ;;  %v5976_v32 = vld [vmem:[#allocation2 + $0x7e8] sm:$0xff]  ;;  %v5300_v36 = vcombine.low %v5958_v9, %v164_v16  ;;  %v167_v55 = vld [vmem:[#allocation2 + $0x3f8] sm:$0xff] }
 0x10a   :  { %v5564_v46 = vpack.c.bf16 %v4461_v41, %v4460_v34  ;;  %5490 = vmatmul.mubr.msk.bf16.vlgmr.msra.gmra.mrb[108].mxu0 %vm1576_vm0, %v5864_v10  ;;  %v4463_v50 = vsel %vm4207_vm4, %v1657_v35, %v4335_v42  ;;  %5491 = vmatmul.mubr.msk.bf16.vlgmr.msra.gmra.mrb[108].mxu1 %vm1576_vm0, %v5864_v10 }
 0x10b   :  { %3877 = vmatpush1.bf16.msra.mxu0 %v5292_v30  ;;  %v5565_v52 = vpack.c.bf16 %v4463_v50, %v4462_v40  ;;  %3918 = vmatpush1.bf16.msra.mxu1 %v5294_v31  ;;  %v5972_v30 = vld [vmem:[#allocation2 + $0x7e0] sm:$0xff]  ;;  %v5974_v31 = vld [vmem:[#allocation2 + $0x5e8] sm:$0xff] }
 0x10c   :  { %5100 = vst [vmem:[#allocation7] sm:$0xff] %v5564_v46  ;;  %3878 = vmatprep.subr.bf16.mxu0 %v5421_v37  ;;  %3919 = vmatprep.subr.bf16.mxu1 %v5423_v38  ;;  %v5302_v37 = vcombine.low %v101_v19, %v165_v20  ;;  %v5429_v43 = vcombine.high %v5969_v26, %v5972_v30 }
 0x10d   :  { %v1696_v56 = vpop.f32.mrb[4].mxu0  ;;  %3908 = vmatprep.mubr.bf16.mxu0 %v5711_v0  ;;  %5101 = vst [vmem:[#allocation7 + $0x8] sm:$0xff] %v5565_v52  ;;  %v1737_v62 = vpop.f32.mrb[4].mxu1  ;;  %3949 = vmatprep.mubr.bf16.mxu1 %v5711_v0  ;;  %v5431_v44 = vcombine.high %v5974_v31, %v5976_v32  ;;  %v5430_v59 = vcombine.low %v5974_v31, %v5976_v32 }
 0x10e   :  { %vm4208_vm5 = vcmp.ge.f32.partialorder %v1696_v56, 0.0  ;;  %v4336_v61 = vmul.f32 0.2, %v1696_v56  ;;  %v1698_v63 = vpop.f32.mrb[5].mxu0  ;;  %vm4210_vm6 = vcmp.ge.f32.partialorder %v1737_v62, 0.0  ;;  %v1739_v27 = vpop.f32.mrb[5].mxu1 }
 0x10f   :  { %v4338_v3 = vmul.f32 0.2, %v1737_v62  ;;  %vm4209_vm7 = vcmp.ge.f32.partialorder %v1698_v63, 0.0  ;;  %v4337_v4 = vmul.f32 0.2, %v1698_v63  ;;  %3879 = vmatpush1.bf16.msra.mxu0 %v5420_v51  ;;  %v1700_v6 = vpop.f32.mrb[6].mxu0  ;;  %3920 = vmatpush1.bf16.msra.mxu1 %v5422_v53 }
 0x110   :  { %v4464_v5 = vsel %vm4208_vm5, %v1696_v56, %v4336_v61  ;;  %3958 = vmatprep.subr.bf16.mxu0 %v5297_v54  ;;  %vm4211_vm8 = vcmp.ge.f32.partialorder %v1739_v27, 0.0  ;;  %v4339_v13 = vmul.f32 0.2, %v1739_v27  ;;  %v1741_v14 = vpop.f32.mrb[6].mxu1  ;;  %v1701_v15 = vpop.f32.mrb[7].mxu0  ;;  %3999 = vmatprep.subr.bf16.mxu1 %v5299_v57  ;;  %v166_v51 = vld [vmem:[#allocation2 + $0x3f0] sm:$0xff]  ;;  %v5428_v57 = vcombine.low %v5969_v26, %v5972_v30 }
 0x111   :  { %v4466_v11 = vsel %vm4210_vm6, %v1737_v62, %v4338_v3  ;;  %v4465_v12 = vsel %vm4209_vm7, %v1698_v63, %v4337_v4  ;;  %v1742_v18 = vpop.f32.mrb[7].mxu1  ;;  %v103_v54 = vld [vmem:[#allocation2 + $0x1f8] sm:$0xff]  ;;  %v5305_v60 = vcombine.high %v5984_v45, %v166_v51  ;;  %v230_v61 = vld [vmem:[#allocation2 + $0x5f0] sm:$0xff]  ;;  %v5304_v6 = vcombine.low %v5984_v45, %v166_v51 }
 0x112   :  { %v5566_v17 = vpack.c.bf16 %v4465_v12, %v4464_v5  ;;  %5492 = vmatmul.mubr.msk.bf16.vlgmr.msra.gmra.mrb[112].mxu0 %vm1576_vm0, %v5864_v10  ;;  %v4467_v21 = vsel %vm4211_vm8, %v1739_v27, %v4339_v13  ;;  %5493 = vmatmul.mubr.msk.bf16.vlgmr.msra.gmra.mrb[112].mxu1 %vm1576_vm0, %v5864_v10  ;;  %v5307_v63 = vcombine.high %v103_v54, %v167_v55  ;;  %v295_v3 = vld [vmem:[#allocation2 + $0x7f8] sm:$0xff] }
 0x113   :  { %3959 = vmatpush1.bf16.msra.mxu0 %v5296_v1  ;;  %v5567_v23 = vpack.c.bf16 %v4467_v21, %v4466_v11  ;;  %4000 = vmatpush1.bf16.msra.mxu1 %v5298_v2  ;;  %v294_v1 = vld [vmem:[#allocation2 + $0x7f0] sm:$0xff]  ;;  %v231_v2 = vld [vmem:[#allocation2 + $0x5f8] sm:$0xff] }
 0x114   :  { %5102 = vst [vmem:[#allocation7 + $0x10] sm:$0xff] %v5566_v17  ;;  %3960 = vmatprep.subr.bf16.mxu0 %v5425_v7  ;;  %4001 = vmatprep.subr.bf16.mxu1 %v5427_v8  ;;  %v5306_v7 = vcombine.low %v103_v54, %v167_v55  ;;  %v5433_v14 = vcombine.high %v230_v61, %v294_v1 }
 0x115   :  { %v1778_v28 = vpop.f32.mrb[8].mxu0  ;;  %3990 = vmatprep.mubr.bf16.mxu0 %v5711_v0  ;;  %5103 = vst [vmem:[#allocation7 + $0x18] sm:$0xff] %v5567_v23  ;;  %v1819_v34 = vpop.f32.mrb[8].mxu1  ;;  %4031 = vmatprep.mubr.bf16.mxu1 %v5711_v0  ;;  %v5435_v15 = vcombine.high %v231_v2, %v295_v3  ;;  %v5434_v26 = vcombine.low %v231_v2, %v295_v3 }
 0x116   :  { %vm4212_vm9 = vcmp.ge.f32.partialorder %v1778_v28, 0.0  ;;  %v4340_v33 = vmul.f32 0.2, %v1778_v28  ;;  %v1780_v35 = vpop.f32.mrb[9].mxu0  ;;  %vm4214_vm10 = vcmp.ge.f32.partialorder %v1819_v34, 0.0  ;;  %v1821_v41 = vpop.f32.mrb[9].mxu1 }
 0x117   :  { %v4342_v38 = vmul.f32 0.2, %v1819_v34  ;;  %vm4213_vm11 = vcmp.ge.f32.partialorder %v1780_v35, 0.0  ;;  %v4341_v39 = vmul.f32 0.2, %v1780_v35  ;;  %3961 = vmatpush1.bf16.msra.mxu0 %v5424_v22  ;;  %v1782_v42 = vpop.f32.mrb[10].mxu0  ;;  %4002 = vmatpush1.bf16.msra.mxu1 %v5426_v24  ;;  %v5432_v24 = vcombine.low %v230_v61, %v294_v1 }
 0x118   :  { %v4468_v40 = vsel %vm4212_vm9, %v1778_v28, %v4340_v33  ;;  %4040 = vmatprep.subr.bf16.mxu0 %v5301_v25  ;;  %vm4215_vm12 = vcmp.ge.f32.partialorder %v1821_v41, 0.0  ;;  %v4343_v48 = vmul.f32 0.2, %v1821_v41  ;;  %v1823_v49 = vpop.f32.mrb[10].mxu1  ;;  %v1783_v50 = vpop.f32.mrb[11].mxu0  ;;  %4081 = vmatprep.subr.bf16.mxu1 %v5303_v29 }
 0x119   :  { %v4470_v46 = vsel %vm4214_vm10, %v1819_v34, %v4342_v38  ;;  %v4469_v47 = vsel %vm4213_vm11, %v1780_v35, %v4341_v39  ;;  %v1824_v53 = vpop.f32.mrb[11].mxu1 }
 0x11a   :  { %v5568_v52 = vpack.c.bf16 %v4469_v47, %v4468_v40  ;;  %5494 = vmatmul.mubr.msk.bf16.vlgmr.msra.gmra.mrb[116].mxu0 %vm1576_vm0, %v5864_v10  ;;  %v4471_v56 = vsel %vm4215_vm12, %v1821_v41, %v4343_v48  ;;  %5495 = vmatmul.mubr.msk.bf16.vlgmr.msra.gmra.mrb[116].mxu1 %vm1576_vm0, %v5864_v10 }
 0x11b   :  { %4041 = vmatpush1.bf16.msra.mxu0 %v5300_v36  ;;  %v5569_v58 = vpack.c.bf16 %v4471_v56, %v4470_v46  ;;  %4082 = vmatpush1.bf16.msra.mxu1 %v5302_v37 }
 0x11c   :  { %5104 = vst [vmem:[#allocation7 + $0x20] sm:$0xff] %v5568_v52  ;;  %4042 = vmatprep.subr.bf16.mxu0 %v5429_v43  ;;  %4083 = vmatprep.subr.bf16.mxu1 %v5431_v44 }
 0x11d   :  { %v1860_v62 = vpop.f32.mrb[12].mxu0  ;;  %4072 = vmatprep.mubr.bf16.mxu0 %v5711_v0  ;;  %5105 = vst [vmem:[#allocation7 + $0x28] sm:$0xff] %v5569_v58  ;;  %v1901_v5 = vpop.f32.mrb[12].mxu1  ;;  %4113 = vmatprep.mubr.bf16.mxu1 %v5711_v0 }
 0x11e   :  { %vm4216_vm13 = vcmp.ge.f32.partialorder %v1860_v62, 0.0  ;;  %v4344_v4 = vmul.f32 0.2, %v1860_v62  ;;  %v1862_v27 = vpop.f32.mrb[13].mxu0  ;;  %vm4218_vm14 = vcmp.ge.f32.partialorder %v1901_v5, 0.0  ;;  %v1903_v12 = vpop.f32.mrb[13].mxu1 }
 0x11f   :  { %v4346_v8 = vmul.f32 0.2, %v1901_v5  ;;  %vm4217_vm15 = vcmp.ge.f32.partialorder %v1862_v27, 0.0  ;;  %v4345_v9 = vmul.f32 0.2, %v1862_v27  ;;  %4043 = vmatpush1.bf16.msra.mxu0 %v5428_v57  ;;  %v1864_v13 = vpop.f32.mrb[14].mxu0  ;;  %4084 = vmatpush1.bf16.msra.mxu1 %v5430_v59 }
 0x120   :  { %v4472_v11 = vsel %vm4216_vm13, %v1860_v62, %v4344_v4  ;;  %4122 = vmatprep.subr.bf16.mxu0 %v5305_v60  ;;  %vm4219_vm1 = vcmp.ge.f32.partialorder %v1903_v12, 0.0  ;;  %v4347_v18 = vmul.f32 0.2, %v1903_v12  ;;  %v1905_v19 = vpop.f32.mrb[14].mxu1  ;;  %v1865_v20 = vpop.f32.mrb[15].mxu0  ;;  %4163 = vmatprep.subr.bf16.mxu1 %v5307_v63 }
 0x121   :  { %v4474_v16 = vsel %vm4218_vm14, %v1901_v5, %v4346_v8  ;;  %v4473_v17 = vsel %vm4217_vm15, %v1862_v27, %v4345_v9  ;;  %v1906_v22 = vpop.f32.mrb[15].mxu1 }
 0x122   :  { %v5570_v21 = vpack.c.bf16 %v4473_v17, %v4472_v11  ;;  %5496 = vmatmul.mubr.msk.bf16.vlgmr.msra.gmra.mrb[120].mxu0 %vm1576_vm0, %v5864_v10  ;;  %v4475_v23 = vsel %vm4219_vm1, %v1903_v12, %v4347_v18  ;;  %5497 = vmatmul.mubr.msk.bf16.vlgmr.msra.gmra.mrb[120].mxu1 %vm1576_vm0, %v5864_v10 }
 0x123   :  { %4123 = vmatpush1.bf16.msra.mxu0 %v5304_v6  ;;  %v5571_v25 = vpack.c.bf16 %v4475_v23, %v4474_v16  ;;  %4164 = vmatpush1.bf16.msra.mxu1 %v5306_v7 }
 0x124   :  { %5106 = vst [vmem:[#allocation7 + $0x30] sm:$0xff] %v5570_v21  ;;  %4124 = vmatprep.subr.bf16.mxu0 %v5433_v14  ;;  %4165 = vmatprep.subr.bf16.mxu1 %v5435_v15 }
 0x125   :  { %v1942_v28 = vpop.f32.mrb[16].mxu0  ;;  %4154 = vmatprep.mubr.bf16.mxu0 %v5711_v0  ;;  %5107 = vst [vmem:[#allocation7 + $0x38] sm:$0xff] %v5571_v25  ;;  %v1983_v30 = vpop.f32.mrb[16].mxu1  ;;  %4195 = vmatprep.mubr.bf16.mxu1 %v5711_v0 }
 0x126   :  { %vm4220_vm2 = vcmp.ge.f32.partialorder %v1942_v28, 0.0  ;;  %v4348_v29 = vmul.f32 0.2, %v1942_v28  ;;  %v1944_v31 = vpop.f32.mrb[17].mxu0  ;;  %vm4222_vm3 = vcmp.ge.f32.partialorder %v1983_v30, 0.0  ;;  %v1985_v35 = vpop.f32.mrb[17].mxu1 }
 0x127   :  { %v4350_v32 = vmul.f32 0.2, %v1983_v30  ;;  %vm4221_vm4 = vcmp.ge.f32.partialorder %v1944_v31, 0.0  ;;  %v4349_v33 = vmul.f32 0.2, %v1944_v31  ;;  %4125 = vmatpush1.bf16.msra.mxu0 %v5432_v24  ;;  %v1946_v36 = vpop.f32.mrb[18].mxu0  ;;  %4166 = vmatpush1.bf16.msra.mxu1 %v5434_v26 }
 0x128   :  { %v4476_v34 = vsel %vm4220_vm2, %v1942_v28, %v4348_v29  ;;  %vm4223_vm5 = vcmp.ge.f32.partialorder %v1985_v35, 0.0  ;;  %v4351_v39 = vmul.f32 0.2, %v1985_v35  ;;  %v1987_v40 = vpop.f32.mrb[18].mxu1  ;;  %v1947_v41 = vpop.f32.mrb[19].mxu0 }
 0x129   :  { %v4478_v37 = vsel %vm4222_vm3, %v1983_v30, %v4350_v32  ;;  %v4477_v38 = vsel %vm4221_vm4, %v1944_v31, %v4349_v33  ;;  %v1988_v43 = vpop.f32.mrb[19].mxu1 }
 0x12a   :  { %v5572_v42 = vpack.c.bf16 %v4477_v38, %v4476_v34  ;;  %5498 = vmatmul.mubr.msk.bf16.vlgmr.msra.gmra.mrb[124].mxu0 %vm1576_vm0, %v5864_v10  ;;  %v4479_v0 = vsel %vm4223_vm5, %v1985_v35, %v4351_v39  ;;  %5499 = vmatmul.mubr.msk.bf16.vlgmr.msra.gmra.mrb[124].mxu1 %vm1576_vm0, %v5864_v10 }
 0x12b   :  { %v5573_v44 = vpack.c.bf16 %v4479_v0, %v4478_v37 }
 0x12c   :  { %5108 = vst [vmem:[#allocation7 + $0x40] sm:$0xff] %v5572_v42 }
 0x12d   :  { %v2024_v45 = vpop.f32.mrb[20].mxu0  ;;  %5109 = vst [vmem:[#allocation7 + $0x48] sm:$0xff] %v5573_v44  ;;  %v2065_v47 = vpop.f32.mrb[20].mxu1 }
 0x12e   :  { %vm4224_vm6 = vcmp.ge.f32.partialorder %v2024_v45, 0.0  ;;  %v4352_v46 = vmul.f32 0.2, %v2024_v45  ;;  %v2026_v48 = vpop.f32.mrb[21].mxu0  ;;  %vm4226_vm7 = vcmp.ge.f32.partialorder %v2065_v47, 0.0  ;;  %v2067_v52 = vpop.f32.mrb[21].mxu1 }
 0x12f   :  { %v4354_v49 = vmul.f32 0.2, %v2065_v47  ;;  %vm4225_vm8 = vcmp.ge.f32.partialorder %v2026_v48, 0.0  ;;  %v4353_v50 = vmul.f32 0.2, %v2026_v48  ;;  %v2028_v53 = vpop.f32.mrb[22].mxu0 }
 0x130   :  { %v4480_v51 = vsel %vm4224_vm6, %v2024_v45, %v4352_v46  ;;  %vm4227_vm9 = vcmp.ge.f32.partialorder %v2067_v52, 0.0  ;;  %v4355_v56 = vmul.f32 0.2, %v2067_v52  ;;  %v2069_v10 = vpop.f32.mrb[22].mxu1  ;;  %v2029_v57 = vpop.f32.mrb[23].mxu0 }
 0x131   :  { %v4482_v54 = vsel %vm4226_vm7, %v2065_v47, %v4354_v49  ;;  %v4481_v55 = vsel %vm4225_vm8, %v2026_v48, %v4353_v50  ;;  %v2070_v59 = vpop.f32.mrb[23].mxu1 }
 0x132   :  { %v5574_v58 = vpack.c.bf16 %v4481_v55, %v4480_v51  ;;  %v4483_v60 = vsel %vm4227_vm9, %v2067_v52, %v4355_v56 }
 0x133   :  { %v5575_v61 = vpack.c.bf16 %v4483_v60, %v4482_v54 }
 0x134   :  { %5110 = vst [vmem:[#allocation7 + $0x50] sm:$0xff] %v5574_v58 }
 0x135   :  { %v2106_v62 = vpop.f32.mrb[24].mxu0  ;;  %5111 = vst [vmem:[#allocation7 + $0x58] sm:$0xff] %v5575_v61  ;;  %v2147_v1 = vpop.f32.mrb[24].mxu1 }
 0x136   :  { %vm4228_vm0 = vcmp.ge.f32.partialorder %v2106_v62, 0.0  ;;  %v4356_v63 = vmul.f32 0.2, %v2106_v62  ;;  %v2108_v2 = vpop.f32.mrb[25].mxu0  ;;  %vm4230_vm10 = vcmp.ge.f32.partialorder %v2147_v1, 0.0  ;;  %v2149_v27 = vpop.f32.mrb[25].mxu1 }
 0x137   :  { %v4358_v3 = vmul.f32 0.2, %v2147_v1  ;;  %vm4229_vm11 = vcmp.ge.f32.partialorder %v2108_v2, 0.0  ;;  %v4357_v4 = vmul.f32 0.2, %v2108_v2  ;;  %v2110_v6 = vpop.f32.mrb[26].mxu0 }
 0x138   :  { %v4484_v5 = vsel %vm4228_vm0, %v2106_v62, %v4356_v63  ;;  %vm4231_vm12 = vcmp.ge.f32.partialorder %v2149_v27, 0.0  ;;  %v4359_v9 = vmul.f32 0.2, %v2149_v27  ;;  %v2151_v11 = vpop.f32.mrb[26].mxu1  ;;  %v2111_v12 = vpop.f32.mrb[27].mxu0 }
 0x139   :  { %v4486_v7 = vsel %vm4230_vm10, %v2147_v1, %v4358_v3  ;;  %v4485_v8 = vsel %vm4229_vm11, %v2108_v2, %v4357_v4  ;;  %v2152_v14 = vpop.f32.mrb[27].mxu1 }
 0x13a   :  { %v5576_v13 = vpack.c.bf16 %v4485_v8, %v4484_v5  ;;  %v4487_v15 = vsel %vm4231_vm12, %v2149_v27, %v4359_v9 }
 0x13b   :  { %v5577_v16 = vpack.c.bf16 %v4487_v15, %v4486_v7 }
 0x13c   :  { %5112 = vst [vmem:[#allocation7 + $0x60] sm:$0xff] %v5576_v13 }
 0x13d   :  { %v2188_v17 = vpop.f32.mrb[28].mxu0  ;;  %5113 = vst [vmem:[#allocation7 + $0x68] sm:$0xff] %v5577_v16  ;;  %v2229_v19 = vpop.f32.mrb[28].mxu1 }
 0x13e   :  { %vm4232_vm13 = vcmp.ge.f32.partialorder %v2188_v17, 0.0  ;;  %v4360_v18 = vmul.f32 0.2, %v2188_v17  ;;  %v2190_v20 = vpop.f32.mrb[29].mxu0  ;;  %vm4234_vm14 = vcmp.ge.f32.partialorder %v2229_v19, 0.0  ;;  %v2231_v24 = vpop.f32.mrb[29].mxu1 }
 0x13f   :  { %v4362_v21 = vmul.f32 0.2, %v2229_v19  ;;  %vm4233_vm15 = vcmp.ge.f32.partialorder %v2190_v20, 0.0  ;;  %v4361_v22 = vmul.f32 0.2, %v2190_v20  ;;  %v2192_v25 = vpop.f32.mrb[30].mxu0 }
 0x140   :  { %v4488_v23 = vsel %vm4232_vm13, %v2188_v17, %v4360_v18  ;;  %vm4235_vm1 = vcmp.ge.f32.partialorder %v2231_v24, 0.0  ;;  %v4363_v29 = vmul.f32 0.2, %v2231_v24  ;;  %v2233_v30 = vpop.f32.mrb[30].mxu1  ;;  %v2193_v31 = vpop.f32.mrb[31].mxu0 }
 0x141   :  { %v4490_v26 = vsel %vm4234_vm14, %v2229_v19, %v4362_v21  ;;  %v4489_v28 = vsel %vm4233_vm15, %v2190_v20, %v4361_v22  ;;  %v2234_v33 = vpop.f32.mrb[31].mxu1 }
 0x142   :  { %v5578_v32 = vpack.c.bf16 %v4489_v28, %v4488_v23  ;;  %v4491_v34 = vsel %vm4235_vm1, %v2231_v24, %v4363_v29 }
 0x143   :  { %v5579_v35 = vpack.c.bf16 %v4491_v34, %v4490_v26 }
 0x144   :  { %5114 = vst [vmem:[#allocation7 + $0x70] sm:$0xff] %v5578_v32 }
 0x145   :  { %v2270_v36 = vpop.f32.mrb[32].mxu0  ;;  %5115 = vst [vmem:[#allocation7 + $0x78] sm:$0xff] %v5579_v35  ;;  %v2311_v38 = vpop.f32.mrb[32].mxu1 }
 0x146   :  { %vm4236_vm2 = vcmp.ge.f32.partialorder %v2270_v36, 0.0  ;;  %v4364_v37 = vmul.f32 0.2, %v2270_v36  ;;  %v2272_v39 = vpop.f32.mrb[33].mxu0  ;;  %vm4238_vm3 = vcmp.ge.f32.partialorder %v2311_v38, 0.0  ;;  %v2313_v43 = vpop.f32.mrb[33].mxu1 }
 0x147   :  { %v4366_v40 = vmul.f32 0.2, %v2311_v38  ;;  %vm4237_vm4 = vcmp.ge.f32.partialorder %v2272_v39, 0.0  ;;  %v4365_v41 = vmul.f32 0.2, %v2272_v39  ;;  %v2274_v0 = vpop.f32.mrb[34].mxu0 }
 0x148   :  { %v4492_v42 = vsel %vm4236_vm2, %v2270_v36, %v4364_v37  ;;  %vm4239_vm5 = vcmp.ge.f32.partialorder %v2313_v43, 0.0  ;;  %v4367_v46 = vmul.f32 0.2, %v2313_v43  ;;  %v2315_v47 = vpop.f32.mrb[34].mxu1  ;;  %v2275_v48 = vpop.f32.mrb[35].mxu0 }
 0x149   :  { %v4494_v44 = vsel %vm4238_vm3, %v2311_v38, %v4366_v40  ;;  %v4493_v45 = vsel %vm4237_vm4, %v2272_v39, %v4365_v41  ;;  %v2316_v50 = vpop.f32.mrb[35].mxu1 }
 0x14a   :  { %v5580_v49 = vpack.c.bf16 %v4493_v45, %v4492_v42  ;;  %v4495_v51 = vsel %vm4239_vm5, %v2313_v43, %v4367_v46 }
 0x14b   :  { %v5581_v52 = vpack.c.bf16 %v4495_v51, %v4494_v44 }
 0x14c   :  { %5116 = vst [vmem:[#allocation7 + $0x80] sm:$0xff] %v5580_v49 }
 0x14d   :  { %v2352_v53 = vpop.f32.mrb[36].mxu0  ;;  %5117 = vst [vmem:[#allocation7 + $0x88] sm:$0xff] %v5581_v52  ;;  %v2393_v55 = vpop.f32.mrb[36].mxu1 }
 0x14e   :  { %vm4240_vm6 = vcmp.ge.f32.partialorder %v2352_v53, 0.0  ;;  %v4368_v54 = vmul.f32 0.2, %v2352_v53  ;;  %v2354_v56 = vpop.f32.mrb[37].mxu0  ;;  %vm4242_vm7 = vcmp.ge.f32.partialorder %v2393_v55, 0.0  ;;  %v2395_v59 = vpop.f32.mrb[37].mxu1 }
 0x14f   :  { %v4370_v10 = vmul.f32 0.2, %v2393_v55  ;;  %vm4241_vm8 = vcmp.ge.f32.partialorder %v2354_v56, 0.0  ;;  %v4369_v57 = vmul.f32 0.2, %v2354_v56  ;;  %v2356_v60 = vpop.f32.mrb[38].mxu0 }
 0x150   :  { %v4496_v58 = vsel %vm4240_vm6, %v2352_v53, %v4368_v54  ;;  %vm4243_vm9 = vcmp.ge.f32.partialorder %v2395_v59, 0.0  ;;  %v4371_v63 = vmul.f32 0.2, %v2395_v59  ;;  %v2397_v1 = vpop.f32.mrb[38].mxu1  ;;  %v2357_v2 = vpop.f32.mrb[39].mxu0 }
 0x151   :  { %v4498_v61 = vsel %vm4242_vm7, %v2393_v55, %v4370_v10  ;;  %v4497_v62 = vsel %vm4241_vm8, %v2354_v56, %v4369_v57  ;;  %v2398_v4 = vpop.f32.mrb[39].mxu1 }
 0x152   :  { %v5582_v3 = vpack.c.bf16 %v4497_v62, %v4496_v58  ;;  %v4499_v5 = vsel %vm4243_vm9, %v2395_v59, %v4371_v63 }
 0x153   :  { %v5583_v27 = vpack.c.bf16 %v4499_v5, %v4498_v61 }
 0x154   :  { %5118 = vst [vmem:[#allocation7 + $0x90] sm:$0xff] %v5582_v3 }
 0x155   :  { %v2434_v6 = vpop.f32.mrb[40].mxu0  ;;  %5119 = vst [vmem:[#allocation7 + $0x98] sm:$0xff] %v5583_v27  ;;  %v2475_v8 = vpop.f32.mrb[40].mxu1 }
 0x156   :  { %vm4244_vm0 = vcmp.ge.f32.partialorder %v2434_v6, 0.0  ;;  %v4372_v7 = vmul.f32 0.2, %v2434_v6  ;;  %v2436_v9 = vpop.f32.mrb[41].mxu0  ;;  %vm4246_vm10 = vcmp.ge.f32.partialorder %v2475_v8, 0.0  ;;  %v2477_v14 = vpop.f32.mrb[41].mxu1 }
 0x157   :  { %v4374_v11 = vmul.f32 0.2, %v2475_v8  ;;  %vm4245_vm11 = vcmp.ge.f32.partialorder %v2436_v9, 0.0  ;;  %v4373_v12 = vmul.f32 0.2, %v2436_v9  ;;  %v2438_v15 = vpop.f32.mrb[42].mxu0 }
 0x158   :  { %v4500_v13 = vsel %vm4244_vm0, %v2434_v6, %v4372_v7  ;;  %vm4247_vm12 = vcmp.ge.f32.partialorder %v2477_v14, 0.0  ;;  %v4375_v18 = vmul.f32 0.2, %v2477_v14  ;;  %v2479_v19 = vpop.f32.mrb[42].mxu1  ;;  %v2439_v20 = vpop.f32.mrb[43].mxu0 }
 0x159   :  { %v4502_v16 = vsel %vm4246_vm10, %v2475_v8, %v4374_v11  ;;  %v4501_v17 = vsel %vm4245_vm11, %v2436_v9, %v4373_v12  ;;  %v2480_v22 = vpop.f32.mrb[43].mxu1 }
 0x15a   :  { %v5584_v21 = vpack.c.bf16 %v4501_v17, %v4500_v13  ;;  %v4503_v23 = vsel %vm4247_vm12, %v2477_v14, %v4375_v18 }
 0x15b   :  { %v5585_v24 = vpack.c.bf16 %v4503_v23, %v4502_v16 }
 0x15c   :  { %5120 = vst [vmem:[#allocation7 + $0xa0] sm:$0xff] %v5584_v21 }
 0x15d   :  { %v2516_v25 = vpop.f32.mrb[44].mxu0  ;;  %5121 = vst [vmem:[#allocation7 + $0xa8] sm:$0xff] %v5585_v24  ;;  %v2557_v28 = vpop.f32.mrb[44].mxu1 }
 0x15e   :  { %vm4248_vm13 = vcmp.ge.f32.partialorder %v2516_v25, 0.0  ;;  %v4376_v26 = vmul.f32 0.2, %v2516_v25  ;;  %v2518_v29 = vpop.f32.mrb[45].mxu0  ;;  %vm4250_vm14 = vcmp.ge.f32.partialorder %v2557_v28, 0.0  ;;  %v2559_v33 = vpop.f32.mrb[45].mxu1 }
 0x15f   :  { %v4378_v30 = vmul.f32 0.2, %v2557_v28  ;;  %vm4249_vm15 = vcmp.ge.f32.partialorder %v2518_v29, 0.0  ;;  %v4377_v31 = vmul.f32 0.2, %v2518_v29  ;;  %v2520_v34 = vpop.f32.mrb[46].mxu0 }
 0x160   :  { %v4504_v32 = vsel %vm4248_vm13, %v2516_v25, %v4376_v26  ;;  %vm4251_vm1 = vcmp.ge.f32.partialorder %v2559_v33, 0.0  ;;  %v4379_v37 = vmul.f32 0.2, %v2559_v33  ;;  %v2561_v38 = vpop.f32.mrb[46].mxu1  ;;  %v2521_v39 = vpop.f32.mrb[47].mxu0 }
 0x161   :  { %v4506_v35 = vsel %vm4250_vm14, %v2557_v28, %v4378_v30  ;;  %v4505_v36 = vsel %vm4249_vm15, %v2518_v29, %v4377_v31  ;;  %v2562_v41 = vpop.f32.mrb[47].mxu1 }
 0x162   :  { %v5586_v40 = vpack.c.bf16 %v4505_v36, %v4504_v32  ;;  %v4507_v42 = vsel %vm4251_vm1, %v2559_v33, %v4379_v37 }
 0x163   :  { %v5587_v43 = vpack.c.bf16 %v4507_v42, %v4506_v35 }
 0x164   :  { %5122 = vst [vmem:[#allocation7 + $0xb0] sm:$0xff] %v5586_v40 }
 0x165   :  { %v2598_v0 = vpop.f32.mrb[48].mxu0  ;;  %5123 = vst [vmem:[#allocation7 + $0xb8] sm:$0xff] %v5587_v43  ;;  %v2639_v45 = vpop.f32.mrb[48].mxu1 }
 0x166   :  { %vm4252_vm2 = vcmp.ge.f32.partialorder %v2598_v0, 0.0  ;;  %v4380_v44 = vmul.f32 0.2, %v2598_v0  ;;  %v2600_v46 = vpop.f32.mrb[49].mxu0  ;;  %vm4254_vm3 = vcmp.ge.f32.partialorder %v2639_v45, 0.0  ;;  %v2641_v50 = vpop.f32.mrb[49].mxu1 }
 0x167   :  { %v4382_v47 = vmul.f32 0.2, %v2639_v45  ;;  %vm4253_vm4 = vcmp.ge.f32.partialorder %v2600_v46, 0.0  ;;  %v4381_v48 = vmul.f32 0.2, %v2600_v46  ;;  %v2602_v51 = vpop.f32.mrb[50].mxu0 }
 0x168   :  { %v4508_v49 = vsel %vm4252_vm2, %v2598_v0, %v4380_v44  ;;  %vm4255_vm5 = vcmp.ge.f32.partialorder %v2641_v50, 0.0  ;;  %v4383_v54 = vmul.f32 0.2, %v2641_v50  ;;  %v2643_v55 = vpop.f32.mrb[50].mxu1  ;;  %v2603_v56 = vpop.f32.mrb[51].mxu0 }
 0x169   :  { %v4510_v52 = vsel %vm4254_vm3, %v2639_v45, %v4382_v47  ;;  %v4509_v53 = vsel %vm4253_vm4, %v2600_v46, %v4381_v48  ;;  %v2644_v57 = vpop.f32.mrb[51].mxu1 }
 0x16a   :  { %v5588_v10 = vpack.c.bf16 %v4509_v53, %v4508_v49  ;;  %v4511_v58 = vsel %vm4255_vm5, %v2641_v50, %v4383_v54 }
 0x16b   :  { %v5589_v59 = vpack.c.bf16 %v4511_v58, %v4510_v52 }
 0x16c   :  { %5124 = vst [vmem:[#allocation7 + $0xc0] sm:$0xff] %v5588_v10 }
 0x16d   :  { %v2680_v60 = vpop.f32.mrb[52].mxu0  ;;  %5125 = vst [vmem:[#allocation7 + $0xc8] sm:$0xff] %v5589_v59  ;;  %v2721_v62 = vpop.f32.mrb[52].mxu1 }
 0x16e   :  { %vm4256_vm6 = vcmp.ge.f32.partialorder %v2680_v60, 0.0  ;;  %v4384_v61 = vmul.f32 0.2, %v2680_v60  ;;  %v2682_v63 = vpop.f32.mrb[53].mxu0  ;;  %vm4258_vm7 = vcmp.ge.f32.partialorder %v2721_v62, 0.0  ;;  %v2723_v4 = vpop.f32.mrb[53].mxu1 }
 0x16f   :  { %v4386_v1 = vmul.f32 0.2, %v2721_v62  ;;  %vm4257_vm8 = vcmp.ge.f32.partialorder %v2682_v63, 0.0  ;;  %v4385_v2 = vmul.f32 0.2, %v2682_v63  ;;  %v2684_v5 = vpop.f32.mrb[54].mxu0 }
 0x170   :  { %v4512_v3 = vsel %vm4256_vm6, %v2680_v60, %v4384_v61  ;;  %vm4259_vm9 = vcmp.ge.f32.partialorder %v2723_v4, 0.0  ;;  %v4387_v7 = vmul.f32 0.2, %v2723_v4  ;;  %v2725_v8 = vpop.f32.mrb[54].mxu1  ;;  %v2685_v9 = vpop.f32.mrb[55].mxu0 }
 0x171   :  { %v4514_v27 = vsel %vm4258_vm7, %v2721_v62, %v4386_v1  ;;  %v4513_v6 = vsel %vm4257_vm8, %v2682_v63, %v4385_v2  ;;  %v2726_v12 = vpop.f32.mrb[55].mxu1 }
 0x172   :  { %v5590_v11 = vpack.c.bf16 %v4513_v6, %v4512_v3  ;;  %v4515_v13 = vsel %vm4259_vm9, %v2723_v4, %v4387_v7 }
 0x173   :  { %v5591_v14 = vpack.c.bf16 %v4515_v13, %v4514_v27 }
 0x174   :  { %5126 = vst [vmem:[#allocation7 + $0xd0] sm:$0xff] %v5590_v11 }
 0x175   :  { %v2762_v15 = vpop.f32.mrb[56].mxu0  ;;  %5127 = vst [vmem:[#allocation7 + $0xd8] sm:$0xff] %v5591_v14  ;;  %v2803_v17 = vpop.f32.mrb[56].mxu1 }
 0x176   :  { %vm4260_vm0 = vcmp.ge.f32.partialorder %v2762_v15, 0.0  ;;  %v4388_v16 = vmul.f32 0.2, %v2762_v15  ;;  %v2764_v18 = vpop.f32.mrb[57].mxu0  ;;  %vm4262_vm10 = vcmp.ge.f32.partialorder %v2803_v17, 0.0  ;;  %v2805_v22 = vpop.f32.mrb[57].mxu1 }
 0x177   :  { %v4390_v19 = vmul.f32 0.2, %v2803_v17  ;;  %vm4261_vm11 = vcmp.ge.f32.partialorder %v2764_v18, 0.0  ;;  %v4389_v20 = vmul.f32 0.2, %v2764_v18  ;;  %v2766_v23 = vpop.f32.mrb[58].mxu0 }
 0x178   :  { %v4516_v21 = vsel %vm4260_vm0, %v2762_v15, %v4388_v16  ;;  %vm4263_vm12 = vcmp.ge.f32.partialorder %v2805_v22, 0.0  ;;  %v4391_v26 = vmul.f32 0.2, %v2805_v22  ;;  %v2807_v28 = vpop.f32.mrb[58].mxu1  ;;  %v2767_v29 = vpop.f32.mrb[59].mxu0 }
 0x179   :  { %v4518_v24 = vsel %vm4262_vm10, %v2803_v17, %v4390_v19  ;;  %v4517_v25 = vsel %vm4261_vm11, %v2764_v18, %v4389_v20  ;;  %v2808_v31 = vpop.f32.mrb[59].mxu1 }
 0x17a   :  { %v5592_v30 = vpack.c.bf16 %v4517_v25, %v4516_v21  ;;  %v4519_v32 = vsel %vm4263_vm12, %v2805_v22, %v4391_v26 }
 0x17b   :  { %v5593_v33 = vpack.c.bf16 %v4519_v32, %v4518_v24 }
 0x17c   :  { %5128 = vst [vmem:[#allocation7 + $0xe0] sm:$0xff] %v5592_v30 }
 0x17d   :  { %v2844_v34 = vpop.f32.mrb[60].mxu0  ;;  %5129 = vst [vmem:[#allocation7 + $0xe8] sm:$0xff] %v5593_v33  ;;  %v2885_v36 = vpop.f32.mrb[60].mxu1 }
 0x17e   :  { %vm4264_vm13 = vcmp.ge.f32.partialorder %v2844_v34, 0.0  ;;  %v4392_v35 = vmul.f32 0.2, %v2844_v34  ;;  %v2846_v37 = vpop.f32.mrb[61].mxu0  ;;  %vm4266_vm14 = vcmp.ge.f32.partialorder %v2885_v36, 0.0  ;;  %v2887_v41 = vpop.f32.mrb[61].mxu1 }
 0x17f   :  { %v4394_v38 = vmul.f32 0.2, %v2885_v36  ;;  %vm4265_vm15 = vcmp.ge.f32.partialorder %v2846_v37, 0.0  ;;  %v4393_v39 = vmul.f32 0.2, %v2846_v37  ;;  %v2848_v42 = vpop.f32.mrb[62].mxu0 }
 0x180   :  { %v4520_v40 = vsel %vm4264_vm13, %v2844_v34, %v4392_v35  ;;  %vm4267_vm1 = vcmp.ge.f32.partialorder %v2887_v41, 0.0  ;;  %v4395_v44 = vmul.f32 0.2, %v2887_v41  ;;  %v2889_v45 = vpop.f32.mrb[62].mxu1  ;;  %v2849_v46 = vpop.f32.mrb[63].mxu0 }
 0x181   :  { %v4522_v43 = vsel %vm4266_vm14, %v2885_v36, %v4394_v38  ;;  %v4521_v0 = vsel %vm4265_vm15, %v2846_v37, %v4393_v39  ;;  %v2890_v48 = vpop.f32.mrb[63].mxu1 }
 0x182   :  { %v5594_v47 = vpack.c.bf16 %v4521_v0, %v4520_v40  ;;  %v4523_v49 = vsel %vm4267_vm1, %v2887_v41, %v4395_v44 }
 0x183   :  { %v5595_v50 = vpack.c.bf16 %v4523_v49, %v4522_v43 }
 0x184   :  { %5130 = vst [vmem:[#allocation7 + $0xf0] sm:$0xff] %v5594_v47 }
 0x185   :  { %v2926_v51 = vpop.f32.mrb[64].mxu0  ;;  %5131 = vst [vmem:[#allocation7 + $0xf8] sm:$0xff] %v5595_v50  ;;  %v2967_v53 = vpop.f32.mrb[64].mxu1 }
 0x186   :  { %vm4268_vm2 = vcmp.ge.f32.partialorder %v2926_v51, 0.0  ;;  %v4396_v52 = vmul.f32 0.2, %v2926_v51  ;;  %v2928_v54 = vpop.f32.mrb[65].mxu0  ;;  %vm4270_vm3 = vcmp.ge.f32.partialorder %v2967_v53, 0.0  ;;  %v2969_v57 = vpop.f32.mrb[65].mxu1 }
 0x187   :  { %v4398_v55 = vmul.f32 0.2, %v2967_v53  ;;  %vm4269_vm4 = vcmp.ge.f32.partialorder %v2928_v54, 0.0  ;;  %v4397_v56 = vmul.f32 0.2, %v2928_v54  ;;  %v2930_v58 = vpop.f32.mrb[66].mxu0 }
 0x188   :  { %v4524_v10 = vsel %vm4268_vm2, %v2926_v51, %v4396_v52  ;;  %vm4271_vm5 = vcmp.ge.f32.partialorder %v2969_v57, 0.0  ;;  %v4399_v61 = vmul.f32 0.2, %v2969_v57  ;;  %v2971_v62 = vpop.f32.mrb[66].mxu1  ;;  %v2931_v63 = vpop.f32.mrb[67].mxu0 }
 0x189   :  { %v4526_v59 = vsel %vm4270_vm3, %v2967_v53, %v4398_v55  ;;  %v4525_v60 = vsel %vm4269_vm4, %v2928_v54, %v4397_v56  ;;  %v2972_v2 = vpop.f32.mrb[67].mxu1 }
 0x18a   :  { %v5596_v1 = vpack.c.bf16 %v4525_v60, %v4524_v10  ;;  %v4527_v3 = vsel %vm4271_vm5, %v2969_v57, %v4399_v61 }
 0x18b   :  { %v5597_v4 = vpack.c.bf16 %v4527_v3, %v4526_v59 }
 0x18c   :  { %5132 = vst [vmem:[#allocation7 + $0x100] sm:$0xff] %v5596_v1 }
 0x18d   :  { %v3008_v5 = vpop.f32.mrb[68].mxu0  ;;  %5133 = vst [vmem:[#allocation7 + $0x108] sm:$0xff] %v5597_v4  ;;  %v3049_v6 = vpop.f32.mrb[68].mxu1 }
 0x18e   :  { %vm4272_vm6 = vcmp.ge.f32.partialorder %v3008_v5, 0.0  ;;  %v4400_v27 = vmul.f32 0.2, %v3008_v5  ;;  %v3010_v7 = vpop.f32.mrb[69].mxu0  ;;  %vm4274_vm7 = vcmp.ge.f32.partialorder %v3049_v6, 0.0  ;;  %v3051_v12 = vpop.f32.mrb[69].mxu1 }
 0x18f   :  { %v4402_v8 = vmul.f32 0.2, %v3049_v6  ;;  %vm4273_vm8 = vcmp.ge.f32.partialorder %v3010_v7, 0.0  ;;  %v4401_v9 = vmul.f32 0.2, %v3010_v7  ;;  %v3012_v13 = vpop.f32.mrb[70].mxu0 }
 0x190   :  { %v4528_v11 = vsel %vm4272_vm6, %v3008_v5, %v4400_v27  ;;  %vm4275_vm9 = vcmp.ge.f32.partialorder %v3051_v12, 0.0  ;;  %v4403_v16 = vmul.f32 0.2, %v3051_v12  ;;  %v3053_v17 = vpop.f32.mrb[70].mxu1  ;;  %v3013_v18 = vpop.f32.mrb[71].mxu0 }
 0x191   :  { %v4530_v14 = vsel %vm4274_vm7, %v3049_v6, %v4402_v8  ;;  %v4529_v15 = vsel %vm4273_vm8, %v3010_v7, %v4401_v9  ;;  %v3054_v20 = vpop.f32.mrb[71].mxu1 }
 0x192   :  { %v5598_v19 = vpack.c.bf16 %v4529_v15, %v4528_v11  ;;  %v4531_v21 = vsel %vm4275_vm9, %v3051_v12, %v4403_v16 }
 0x193   :  { %v5599_v22 = vpack.c.bf16 %v4531_v21, %v4530_v14 }
 0x194   :  { %5134 = vst [vmem:[#allocation7 + $0x110] sm:$0xff] %v5598_v19 }
 0x195   :  { %v3090_v23 = vpop.f32.mrb[72].mxu0  ;;  %5135 = vst [vmem:[#allocation7 + $0x118] sm:$0xff] %v5599_v22  ;;  %v3131_v25 = vpop.f32.mrb[72].mxu1 }
 0x196   :  { %vm4276_vm0 = vcmp.ge.f32.partialorder %v3090_v23, 0.0  ;;  %v4404_v24 = vmul.f32 0.2, %v3090_v23  ;;  %v3092_v26 = vpop.f32.mrb[73].mxu0  ;;  %vm4278_vm10 = vcmp.ge.f32.partialorder %v3131_v25, 0.0  ;;  %v3133_v31 = vpop.f32.mrb[73].mxu1 }
 0x197   :  { %v4406_v28 = vmul.f32 0.2, %v3131_v25  ;;  %vm4277_vm11 = vcmp.ge.f32.partialorder %v3092_v26, 0.0  ;;  %v4405_v29 = vmul.f32 0.2, %v3092_v26  ;;  %v3094_v32 = vpop.f32.mrb[74].mxu0 }
 0x198   :  { %v4532_v30 = vsel %vm4276_vm0, %v3090_v23, %v4404_v24  ;;  %vm4279_vm12 = vcmp.ge.f32.partialorder %v3133_v31, 0.0  ;;  %v4407_v35 = vmul.f32 0.2, %v3133_v31  ;;  %v3135_v36 = vpop.f32.mrb[74].mxu1  ;;  %v3095_v37 = vpop.f32.mrb[75].mxu0 }
 0x199   :  { %v4534_v33 = vsel %vm4278_vm10, %v3131_v25, %v4406_v28  ;;  %v4533_v34 = vsel %vm4277_vm11, %v3092_v26, %v4405_v29  ;;  %v3136_v39 = vpop.f32.mrb[75].mxu1 }
 0x19a   :  { %v5600_v38 = vpack.c.bf16 %v4533_v34, %v4532_v30  ;;  %v4535_v40 = vsel %vm4279_vm12, %v3133_v31, %v4407_v35 }
 0x19b   :  { %v5601_v41 = vpack.c.bf16 %v4535_v40, %v4534_v33 }
 0x19c   :  { %5136 = vst [vmem:[#allocation7 + $0x120] sm:$0xff] %v5600_v38 }
 0x19d   :  { %v3172_v42 = vpop.f32.mrb[76].mxu0  ;;  %5137 = vst [vmem:[#allocation7 + $0x128] sm:$0xff] %v5601_v41  ;;  %v3213_v0 = vpop.f32.mrb[76].mxu1 }
 0x19e   :  { %vm4280_vm13 = vcmp.ge.f32.partialorder %v3172_v42, 0.0  ;;  %v4408_v43 = vmul.f32 0.2, %v3172_v42  ;;  %v3174_v44 = vpop.f32.mrb[77].mxu0  ;;  %vm4282_vm14 = vcmp.ge.f32.partialorder %v3213_v0, 0.0  ;;  %v3215_v48 = vpop.f32.mrb[77].mxu1 }
 0x19f   :  { %v4410_v45 = vmul.f32 0.2, %v3213_v0  ;;  %vm4281_vm15 = vcmp.ge.f32.partialorder %v3174_v44, 0.0  ;;  %v4409_v46 = vmul.f32 0.2, %v3174_v44  ;;  %v3176_v49 = vpop.f32.mrb[78].mxu0 }
 0x1a0   :  { %v4536_v47 = vsel %vm4280_vm13, %v3172_v42, %v4408_v43  ;;  %vm4283_vm1 = vcmp.ge.f32.partialorder %v3215_v48, 0.0  ;;  %v4411_v52 = vmul.f32 0.2, %v3215_v48  ;;  %v3217_v53 = vpop.f32.mrb[78].mxu1  ;;  %v3177_v54 = vpop.f32.mrb[79].mxu0 }
 0x1a1   :  { %v4538_v50 = vsel %vm4282_vm14, %v3213_v0, %v4410_v45  ;;  %v4537_v51 = vsel %vm4281_vm15, %v3174_v44, %v4409_v46  ;;  %v3218_v56 = vpop.f32.mrb[79].mxu1 }
 0x1a2   :  { %v5602_v55 = vpack.c.bf16 %v4537_v51, %v4536_v47  ;;  %v4539_v10 = vsel %vm4283_vm1, %v3215_v48, %v4411_v52 }
 0x1a3   :  { %v5603_v57 = vpack.c.bf16 %v4539_v10, %v4538_v50 }
 0x1a4   :  { %5138 = vst [vmem:[#allocation7 + $0x130] sm:$0xff] %v5602_v55 }
 0x1a5   :  { %v3254_v58 = vpop.f32.mrb[80].mxu0  ;;  %5139 = vst [vmem:[#allocation7 + $0x138] sm:$0xff] %v5603_v57  ;;  %v3295_v60 = vpop.f32.mrb[80].mxu1 }
 0x1a6   :  { %vm4284_vm2 = vcmp.ge.f32.partialorder %v3254_v58, 0.0  ;;  %v4412_v59 = vmul.f32 0.2, %v3254_v58  ;;  %v3256_v61 = vpop.f32.mrb[81].mxu0  ;;  %vm4286_vm3 = vcmp.ge.f32.partialorder %v3295_v60, 0.0  ;;  %v3297_v2 = vpop.f32.mrb[81].mxu1 }
 0x1a7   :  { %v4414_v62 = vmul.f32 0.2, %v3295_v60  ;;  %vm4285_vm4 = vcmp.ge.f32.partialorder %v3256_v61, 0.0  ;;  %v4413_v63 = vmul.f32 0.2, %v3256_v61  ;;  %v3258_v3 = vpop.f32.mrb[82].mxu0 }
 0x1a8   :  { %v4540_v1 = vsel %vm4284_vm2, %v3254_v58, %v4412_v59  ;;  %vm4287_vm5 = vcmp.ge.f32.partialorder %v3297_v2, 0.0  ;;  %v4415_v27 = vmul.f32 0.2, %v3297_v2  ;;  %v3299_v6 = vpop.f32.mrb[82].mxu1  ;;  %v3259_v7 = vpop.f32.mrb[83].mxu0 }
 0x1a9   :  { %v4542_v4 = vsel %vm4286_vm3, %v3295_v60, %v4414_v62  ;;  %v4541_v5 = vsel %vm4285_vm4, %v3256_v61, %v4413_v63  ;;  %v3300_v9 = vpop.f32.mrb[83].mxu1 }
 0x1aa   :  { %v5604_v8 = vpack.c.bf16 %v4541_v5, %v4540_v1  ;;  %v4543_v11 = vsel %vm4287_vm5, %v3297_v2, %v4415_v27 }
 0x1ab   :  { %v5605_v12 = vpack.c.bf16 %v4543_v11, %v4542_v4 }
 0x1ac   :  { %5140 = vst [vmem:[#allocation7 + $0x140] sm:$0xff] %v5604_v8 }
 0x1ad   :  { %v3336_v13 = vpop.f32.mrb[84].mxu0  ;;  %5141 = vst [vmem:[#allocation7 + $0x148] sm:$0xff] %v5605_v12  ;;  %v3377_v15 = vpop.f32.mrb[84].mxu1 }
 0x1ae   :  { %vm4288_vm6 = vcmp.ge.f32.partialorder %v3336_v13, 0.0  ;;  %v4416_v14 = vmul.f32 0.2, %v3336_v13  ;;  %v3338_v16 = vpop.f32.mrb[85].mxu0  ;;  %vm4290_vm7 = vcmp.ge.f32.partialorder %v3377_v15, 0.0  ;;  %v3379_v20 = vpop.f32.mrb[85].mxu1 }
 0x1af   :  { %v4418_v17 = vmul.f32 0.2, %v3377_v15  ;;  %vm4289_vm8 = vcmp.ge.f32.partialorder %v3338_v16, 0.0  ;;  %v4417_v18 = vmul.f32 0.2, %v3338_v16  ;;  %v3340_v21 = vpop.f32.mrb[86].mxu0 }
 0x1b0   :  { %v4544_v19 = vsel %vm4288_vm6, %v3336_v13, %v4416_v14  ;;  %vm4291_vm9 = vcmp.ge.f32.partialorder %v3379_v20, 0.0  ;;  %v4419_v24 = vmul.f32 0.2, %v3379_v20  ;;  %v3381_v25 = vpop.f32.mrb[86].mxu1  ;;  %v3341_v26 = vpop.f32.mrb[87].mxu0 }
 0x1b1   :  { %v4546_v22 = vsel %vm4290_vm7, %v3377_v15, %v4418_v17  ;;  %v4545_v23 = vsel %vm4289_vm8, %v3338_v16, %v4417_v18  ;;  %v3382_v29 = vpop.f32.mrb[87].mxu1 }
 0x1b2   :  { %v5606_v28 = vpack.c.bf16 %v4545_v23, %v4544_v19  ;;  %v4547_v30 = vsel %vm4291_vm9, %v3379_v20, %v4419_v24 }
 0x1b3   :  { %v5607_v31 = vpack.c.bf16 %v4547_v30, %v4546_v22 }
 0x1b4   :  { %5142 = vst [vmem:[#allocation7 + $0x150] sm:$0xff] %v5606_v28 }
 0x1b5   :  { %v3418_v32 = vpop.f32.mrb[88].mxu0  ;;  %5143 = vst [vmem:[#allocation7 + $0x158] sm:$0xff] %v5607_v31  ;;  %v3459_v34 = vpop.f32.mrb[88].mxu1 }
 0x1b6   :  { %vm4292_vm0 = vcmp.ge.f32.partialorder %v3418_v32, 0.0  ;;  %v4420_v33 = vmul.f32 0.2, %v3418_v32  ;;  %v3420_v35 = vpop.f32.mrb[89].mxu0  ;;  %vm4294_vm10 = vcmp.ge.f32.partialorder %v3459_v34, 0.0  ;;  %v3461_v39 = vpop.f32.mrb[89].mxu1 }
 0x1b7   :  { %v4422_v36 = vmul.f32 0.2, %v3459_v34  ;;  %vm4293_vm11 = vcmp.ge.f32.partialorder %v3420_v35, 0.0  ;;  %v4421_v37 = vmul.f32 0.2, %v3420_v35  ;;  %v3422_v40 = vpop.f32.mrb[90].mxu0 }
 0x1b8   :  { %v4548_v38 = vsel %vm4292_vm0, %v3418_v32, %v4420_v33  ;;  %vm4295_vm12 = vcmp.ge.f32.partialorder %v3461_v39, 0.0  ;;  %v4423_v43 = vmul.f32 0.2, %v3461_v39  ;;  %v3463_v0 = vpop.f32.mrb[90].mxu1  ;;  %v3423_v44 = vpop.f32.mrb[91].mxu0 }
 0x1b9   :  { %v4550_v41 = vsel %vm4294_vm10, %v3459_v34, %v4422_v36  ;;  %v4549_v42 = vsel %vm4293_vm11, %v3420_v35, %v4421_v37  ;;  %v3464_v46 = vpop.f32.mrb[91].mxu1 }
 0x1ba   :  { %v5608_v45 = vpack.c.bf16 %v4549_v42, %v4548_v38  ;;  %v4551_v47 = vsel %vm4295_vm12, %v3461_v39, %v4423_v43 }
 0x1bb   :  { %v5609_v48 = vpack.c.bf16 %v4551_v47, %v4550_v41 }
 0x1bc   :  { %5144 = vst [vmem:[#allocation7 + $0x160] sm:$0xff] %v5608_v45 }
 0x1bd   :  { %v3500_v49 = vpop.f32.mrb[92].mxu0  ;;  %5145 = vst [vmem:[#allocation7 + $0x168] sm:$0xff] %v5609_v48  ;;  %v3541_v51 = vpop.f32.mrb[92].mxu1 }
 0x1be   :  { %vm4296_vm13 = vcmp.ge.f32.partialorder %v3500_v49, 0.0  ;;  %v4424_v50 = vmul.f32 0.2, %v3500_v49  ;;  %v3502_v52 = vpop.f32.mrb[93].mxu0  ;;  %vm4298_vm14 = vcmp.ge.f32.partialorder %v3541_v51, 0.0  ;;  %v3543_v56 = vpop.f32.mrb[93].mxu1 }
 0x1bf   :  { %v4426_v53 = vmul.f32 0.2, %v3541_v51  ;;  %vm4297_vm15 = vcmp.ge.f32.partialorder %v3502_v52, 0.0  ;;  %v4425_v54 = vmul.f32 0.2, %v3502_v52  ;;  %v3504_v10 = vpop.f32.mrb[94].mxu0 }
 0x1c0   :  { %v4552_v55 = vsel %vm4296_vm13, %v3500_v49, %v4424_v50  ;;  %vm4299_vm1 = vcmp.ge.f32.partialorder %v3543_v56, 0.0  ;;  %v4427_v59 = vmul.f32 0.2, %v3543_v56  ;;  %v3545_v60 = vpop.f32.mrb[94].mxu1  ;;  %v3505_v61 = vpop.f32.mrb[95].mxu0 }
 0x1c1   :  { %v4554_v57 = vsel %vm4298_vm14, %v3541_v51, %v4426_v53  ;;  %v4553_v58 = vsel %vm4297_vm15, %v3502_v52, %v4425_v54  ;;  %v3546_v63 = vpop.f32.mrb[95].mxu1 }
 0x1c2   :  { %v5610_v62 = vpack.c.bf16 %v4553_v58, %v4552_v55  ;;  %v4555_v1 = vsel %vm4299_vm1, %v3543_v56, %v4427_v59 }
 0x1c3   :  { %v5611_v2 = vpack.c.bf16 %v4555_v1, %v4554_v57 }
 0x1c4   :  { %5146 = vst [vmem:[#allocation7 + $0x170] sm:$0xff] %v5610_v62 }
 0x1c5   :  { %v3582_v3 = vpop.f32.mrb[96].mxu0  ;;  %5147 = vst [vmem:[#allocation7 + $0x178] sm:$0xff] %v5611_v2  ;;  %v3623_v5 = vpop.f32.mrb[96].mxu1 }
 0x1c6   :  { %vm4300_vm2 = vcmp.ge.f32.partialorder %v3582_v3, 0.0  ;;  %v4428_v4 = vmul.f32 0.2, %v3582_v3  ;;  %v3584_v27 = vpop.f32.mrb[97].mxu0  ;;  %vm4302_vm3 = vcmp.ge.f32.partialorder %v3623_v5, 0.0  ;;  %v3625_v9 = vpop.f32.mrb[97].mxu1 }
 0x1c7   :  { %v4430_v6 = vmul.f32 0.2, %v3623_v5  ;;  %vm4301_vm4 = vcmp.ge.f32.partialorder %v3584_v27, 0.0  ;;  %v4429_v7 = vmul.f32 0.2, %v3584_v27  ;;  %v3586_v11 = vpop.f32.mrb[98].mxu0 }
 0x1c8   :  { %v4556_v8 = vsel %vm4300_vm2, %v3582_v3, %v4428_v4  ;;  %vm4303_vm5 = vcmp.ge.f32.partialorder %v3625_v9, 0.0  ;;  %v4431_v14 = vmul.f32 0.2, %v3625_v9  ;;  %v3627_v15 = vpop.f32.mrb[98].mxu1  ;;  %v3587_v16 = vpop.f32.mrb[99].mxu0 }
 0x1c9   :  { %v4558_v12 = vsel %vm4302_vm3, %v3623_v5, %v4430_v6  ;;  %v4557_v13 = vsel %vm4301_vm4, %v3584_v27, %v4429_v7  ;;  %v3628_v18 = vpop.f32.mrb[99].mxu1 }
 0x1ca   :  { %v5612_v17 = vpack.c.bf16 %v4557_v13, %v4556_v8  ;;  %v4559_v19 = vsel %vm4303_vm5, %v3625_v9, %v4431_v14 }
 0x1cb   :  { %v5613_v20 = vpack.c.bf16 %v4559_v19, %v4558_v12 }
 0x1cc   :  { %5148 = vst [vmem:[#allocation7 + $0x180] sm:$0xff] %v5612_v17 }
 0x1cd   :  { %v3664_v21 = vpop.f32.mrb[100].mxu0  ;;  %5149 = vst [vmem:[#allocation7 + $0x188] sm:$0xff] %v5613_v20  ;;  %v3705_v23 = vpop.f32.mrb[100].mxu1 }
 0x1ce   :  { %vm4304_vm6 = vcmp.ge.f32.partialorder %v3664_v21, 0.0  ;;  %v4432_v22 = vmul.f32 0.2, %v3664_v21  ;;  %v3666_v24 = vpop.f32.mrb[101].mxu0  ;;  %vm4306_vm7 = vcmp.ge.f32.partialorder %v3705_v23, 0.0  ;;  %v3707_v29 = vpop.f32.mrb[101].mxu1 }
 0x1cf   :  { %v4434_v25 = vmul.f32 0.2, %v3705_v23  ;;  %vm4305_vm8 = vcmp.ge.f32.partialorder %v3666_v24, 0.0  ;;  %v4433_v26 = vmul.f32 0.2, %v3666_v24  ;;  %v3668_v30 = vpop.f32.mrb[102].mxu0 }
 0x1d0   :  { %v4560_v28 = vsel %vm4304_vm6, %v3664_v21, %v4432_v22  ;;  %vm4307_vm9 = vcmp.ge.f32.partialorder %v3707_v29, 0.0  ;;  %v4435_v33 = vmul.f32 0.2, %v3707_v29  ;;  %v3709_v34 = vpop.f32.mrb[102].mxu1  ;;  %v3669_v35 = vpop.f32.mrb[103].mxu0 }
 0x1d1   :  { %v4562_v31 = vsel %vm4306_vm7, %v3705_v23, %v4434_v25  ;;  %v4561_v32 = vsel %vm4305_vm8, %v3666_v24, %v4433_v26  ;;  %v3710_v37 = vpop.f32.mrb[103].mxu1 }
 0x1d2   :  { %v5614_v36 = vpack.c.bf16 %v4561_v32, %v4560_v28  ;;  %v4563_v38 = vsel %vm4307_vm9, %v3707_v29, %v4435_v33 }
 0x1d3   :  { %v5615_v39 = vpack.c.bf16 %v4563_v38, %v4562_v31 }
 0x1d4   :  { %5150 = vst [vmem:[#allocation7 + $0x190] sm:$0xff] %v5614_v36 }
 0x1d5   :  { %v3746_v40 = vpop.f32.mrb[104].mxu0  ;;  %5151 = vst [vmem:[#allocation7 + $0x198] sm:$0xff] %v5615_v39  ;;  %v3787_v42 = vpop.f32.mrb[104].mxu1 }
 0x1d6   :  { %vm4308_vm0 = vcmp.ge.f32.partialorder %v3746_v40, 0.0  ;;  %v4436_v41 = vmul.f32 0.2, %v3746_v40  ;;  %v3748_v43 = vpop.f32.mrb[105].mxu0  ;;  %vm4310_vm10 = vcmp.ge.f32.partialorder %v3787_v42, 0.0  ;;  %v3789_v46 = vpop.f32.mrb[105].mxu1 }
 0x1d7   :  { %v4438_v0 = vmul.f32 0.2, %v3787_v42  ;;  %vm4309_vm11 = vcmp.ge.f32.partialorder %v3748_v43, 0.0  ;;  %v4437_v44 = vmul.f32 0.2, %v3748_v43  ;;  %v3750_v47 = vpop.f32.mrb[106].mxu0 }
 0x1d8   :  { %v4564_v45 = vsel %vm4308_vm0, %v3746_v40, %v4436_v41  ;;  %vm4311_vm12 = vcmp.ge.f32.partialorder %v3789_v46, 0.0  ;;  %v4439_v50 = vmul.f32 0.2, %v3789_v46  ;;  %v3791_v51 = vpop.f32.mrb[106].mxu1  ;;  %v3751_v52 = vpop.f32.mrb[107].mxu0 }
 0x1d9   :  { %v4566_v48 = vsel %vm4310_vm10, %v3787_v42, %v4438_v0  ;;  %v4565_v49 = vsel %vm4309_vm11, %v3748_v43, %v4437_v44  ;;  %v3792_v54 = vpop.f32.mrb[107].mxu1 }
 0x1da   :  { %v5616_v53 = vpack.c.bf16 %v4565_v49, %v4564_v45  ;;  %v4567_v55 = vsel %vm4311_vm12, %v3789_v46, %v4439_v50 }
 0x1db   :  { %v5617_v56 = vpack.c.bf16 %v4567_v55, %v4566_v48 }
 0x1dc   :  { %5152 = vst [vmem:[#allocation7 + $0x1a0] sm:$0xff] %v5616_v53 }
 0x1dd   :  { %v3828_v10 = vpop.f32.mrb[108].mxu0  ;;  %5153 = vst [vmem:[#allocation7 + $0x1a8] sm:$0xff] %v5617_v56  ;;  %v3869_v58 = vpop.f32.mrb[108].mxu1 }
 0x1de   :  { %vm4312_vm13 = vcmp.ge.f32.partialorder %v3828_v10, 0.0  ;;  %v4440_v57 = vmul.f32 0.2, %v3828_v10  ;;  %v3830_v59 = vpop.f32.mrb[109].mxu0  ;;  %vm4314_vm14 = vcmp.ge.f32.partialorder %v3869_v58, 0.0  ;;  %v3871_v63 = vpop.f32.mrb[109].mxu1 }
 0x1df   :  { %v4442_v60 = vmul.f32 0.2, %v3869_v58  ;;  %vm4313_vm15 = vcmp.ge.f32.partialorder %v3830_v59, 0.0  ;;  %v4441_v61 = vmul.f32 0.2, %v3830_v59  ;;  %v3832_v1 = vpop.f32.mrb[110].mxu0 }
 0x1e0   :  { %v4568_v62 = vsel %vm4312_vm13, %v3828_v10, %v4440_v57  ;;  %vm4315_vm1 = vcmp.ge.f32.partialorder %v3871_v63, 0.0  ;;  %v4443_v4 = vmul.f32 0.2, %v3871_v63  ;;  %v3873_v5 = vpop.f32.mrb[110].mxu1  ;;  %v3833_v27 = vpop.f32.mrb[111].mxu0 }
 0x1e1   :  { %v4570_v2 = vsel %vm4314_vm14, %v3869_v58, %v4442_v60  ;;  %v4569_v3 = vsel %vm4313_vm15, %v3830_v59, %v4441_v61  ;;  %v3874_v7 = vpop.f32.mrb[111].mxu1 }
 0x1e2   :  { %v5618_v6 = vpack.c.bf16 %v4569_v3, %v4568_v62  ;;  %v4571_v8 = vsel %vm4315_vm1, %v3871_v63, %v4443_v4 }
 0x1e3   :  { %v5619_v9 = vpack.c.bf16 %v4571_v8, %v4570_v2 }
 0x1e4   :  { %5154 = vst [vmem:[#allocation7 + $0x1b0] sm:$0xff] %v5618_v6 }
 0x1e5   :  { %v3910_v11 = vpop.f32.mrb[112].mxu0  ;;  %5155 = vst [vmem:[#allocation7 + $0x1b8] sm:$0xff] %v5619_v9  ;;  %v3951_v13 = vpop.f32.mrb[112].mxu1 }
 0x1e6   :  { %vm4316_vm2 = vcmp.ge.f32.partialorder %v3910_v11, 0.0  ;;  %v4444_v12 = vmul.f32 0.2, %v3910_v11  ;;  %v3912_v14 = vpop.f32.mrb[113].mxu0  ;;  %vm4318_vm3 = vcmp.ge.f32.partialorder %v3951_v13, 0.0  ;;  %v3953_v18 = vpop.f32.mrb[113].mxu1 }
 0x1e7   :  { %v4446_v15 = vmul.f32 0.2, %v3951_v13  ;;  %vm4317_vm4 = vcmp.ge.f32.partialorder %v3912_v14, 0.0  ;;  %v4445_v16 = vmul.f32 0.2, %v3912_v14  ;;  %v3914_v19 = vpop.f32.mrb[114].mxu0 }
 0x1e8   :  { %v4572_v17 = vsel %vm4316_vm2, %v3910_v11, %v4444_v12  ;;  %vm4319_vm5 = vcmp.ge.f32.partialorder %v3953_v18, 0.0  ;;  %v4447_v22 = vmul.f32 0.2, %v3953_v18  ;;  %v3955_v23 = vpop.f32.mrb[114].mxu1  ;;  %v3915_v24 = vpop.f32.mrb[115].mxu0 }
 0x1e9   :  { %v4574_v20 = vsel %vm4318_vm3, %v3951_v13, %v4446_v15  ;;  %v4573_v21 = vsel %vm4317_vm4, %v3912_v14, %v4445_v16  ;;  %v3956_v26 = vpop.f32.mrb[115].mxu1 }
 0x1ea   :  { %v5620_v25 = vpack.c.bf16 %v4573_v21, %v4572_v17  ;;  %v4575_v28 = vsel %vm4319_vm5, %v3953_v18, %v4447_v22 }
 0x1eb   :  { %v5621_v29 = vpack.c.bf16 %v4575_v28, %v4574_v20 }
 0x1ec   :  { %5156 = vst [vmem:[#allocation7 + $0x1c0] sm:$0xff] %v5620_v25 }
 0x1ed   :  { %v3992_v30 = vpop.f32.mrb[116].mxu0  ;;  %5157 = vst [vmem:[#allocation7 + $0x1c8] sm:$0xff] %v5621_v29  ;;  %v4033_v32 = vpop.f32.mrb[116].mxu1 }
 0x1ee   :  { %vm4320_vm6 = vcmp.ge.f32.partialorder %v3992_v30, 0.0  ;;  %v4448_v31 = vmul.f32 0.2, %v3992_v30  ;;  %v3994_v33 = vpop.f32.mrb[117].mxu0  ;;  %vm4322_vm7 = vcmp.ge.f32.partialorder %v4033_v32, 0.0  ;;  %v4035_v37 = vpop.f32.mrb[117].mxu1 }
 0x1ef   :  { %v4450_v34 = vmul.f32 0.2, %v4033_v32  ;;  %vm4321_vm8 = vcmp.ge.f32.partialorder %v3994_v33, 0.0  ;;  %v4449_v35 = vmul.f32 0.2, %v3994_v33  ;;  %v3996_v38 = vpop.f32.mrb[118].mxu0 }
 0x1f0   :  { %v4576_v36 = vsel %vm4320_vm6, %v3992_v30, %v4448_v31  ;;  %vm4323_vm9 = vcmp.ge.f32.partialorder %v4035_v37, 0.0  ;;  %v4451_v41 = vmul.f32 0.2, %v4035_v37  ;;  %v4037_v42 = vpop.f32.mrb[118].mxu1  ;;  %v3997_v43 = vpop.f32.mrb[119].mxu0 }
 0x1f1   :  { %v4578_v39 = vsel %vm4322_vm7, %v4033_v32, %v4450_v34  ;;  %v4577_v40 = vsel %vm4321_vm8, %v3994_v33, %v4449_v35  ;;  %v4038_v44 = vpop.f32.mrb[119].mxu1 }
 0x1f2   :  { %v5622_v0 = vpack.c.bf16 %v4577_v40, %v4576_v36  ;;  %v4579_v45 = vsel %vm4323_vm9, %v4035_v37, %v4451_v41 }
 0x1f3   :  { %v5623_v46 = vpack.c.bf16 %v4579_v45, %v4578_v39 }
 0x1f4   :  { %5158 = vst [vmem:[#allocation7 + $0x1d0] sm:$0xff] %v5622_v0 }
 0x1f5   :  { %v4074_v47 = vpop.f32.mrb[120].mxu0  ;;  %5159 = vst [vmem:[#allocation7 + $0x1d8] sm:$0xff] %v5623_v46  ;;  %v4115_v49 = vpop.f32.mrb[120].mxu1 }
 0x1f6   :  { %vm4324_vm0 = vcmp.ge.f32.partialorder %v4074_v47, 0.0  ;;  %v4452_v48 = vmul.f32 0.2, %v4074_v47  ;;  %v4076_v50 = vpop.f32.mrb[121].mxu0  ;;  %vm4326_vm10 = vcmp.ge.f32.partialorder %v4115_v49, 0.0  ;;  %v4117_v54 = vpop.f32.mrb[121].mxu1 }
 0x1f7   :  { %v4454_v51 = vmul.f32 0.2, %v4115_v49  ;;  %vm4325_vm11 = vcmp.ge.f32.partialorder %v4076_v50, 0.0  ;;  %v4453_v52 = vmul.f32 0.2, %v4076_v50  ;;  %v4078_v55 = vpop.f32.mrb[122].mxu0 }
 0x1f8   :  { %v4580_v53 = vsel %vm4324_vm0, %v4074_v47, %v4452_v48  ;;  %vm4327_vm12 = vcmp.ge.f32.partialorder %v4117_v54, 0.0  ;;  %v4455_v57 = vmul.f32 0.2, %v4117_v54  ;;  %v4119_v58 = vpop.f32.mrb[122].mxu1  ;;  %v4079_v59 = vpop.f32.mrb[123].mxu0 }
 0x1f9   :  { %v4582_v56 = vsel %vm4326_vm10, %v4115_v49, %v4454_v51  ;;  %v4581_v10 = vsel %vm4325_vm11, %v4076_v50, %v4453_v52  ;;  %v4120_v61 = vpop.f32.mrb[123].mxu1 }
 0x1fa   :  { %v5624_v60 = vpack.c.bf16 %v4581_v10, %v4580_v53  ;;  %v4583_v62 = vsel %vm4327_vm12, %v4117_v54, %v4455_v57 }
 0x1fb   :  { %v5625_v63 = vpack.c.bf16 %v4583_v62, %v4582_v56 }
 0x1fc   :  { %5160 = vst [vmem:[#allocation7 + $0x1e0] sm:$0xff] %v5624_v60 }
 0x1fd   :  { %v4156_v1 = vpop.f32.mrb[124].mxu0  ;;  %5161 = vst [vmem:[#allocation7 + $0x1e8] sm:$0xff] %v5625_v63  ;;  %v4197_v3 = vpop.f32.mrb[124].mxu1 }
 0x1fe   :  { %vm4328_vm13 = vcmp.ge.f32.partialorder %v4156_v1, 0.0  ;;  %v4456_v2 = vmul.f32 0.2, %v4156_v1  ;;  %v4158_v4 = vpop.f32.mrb[125].mxu0  ;;  %vm4330_vm14 = vcmp.ge.f32.partialorder %v4197_v3, 0.0  ;;  %v4199_v7 = vpop.f32.mrb[125].mxu1 }
 0x1ff   :  { %v4458_v5 = vmul.f32 0.2, %v4197_v3  ;;  %vm4329_vm15 = vcmp.ge.f32.partialorder %v4158_v4, 0.0  ;;  %v4457_v27 = vmul.f32 0.2, %v4158_v4  ;;  %v4160_v8 = vpop.f32.mrb[126].mxu0 }
 0x200   :  { %v4584_v6 = vsel %vm4328_vm13, %v4156_v1, %v4456_v2  ;;  %vm4331_vm1 = vcmp.ge.f32.partialorder %v4199_v7, 0.0  ;;  %v4459_v12 = vmul.f32 0.2, %v4199_v7  ;;  %v4201_v13 = vpop.f32.mrb[126].mxu1  ;;  %v4161_v14 = vpop.f32.mrb[127].mxu0 }
 0x201   :  { %v4586_v9 = vsel %vm4330_vm14, %v4197_v3, %v4458_v5  ;;  %v4585_v11 = vsel %vm4329_vm15, %v4158_v4, %v4457_v27  ;;  %v4202_v16 = vpop.f32.mrb[127].mxu1 }
 0x202   :  { %v5626_v15 = vpack.c.bf16 %v4585_v11, %v4584_v6  ;;  %v4587_v17 = vsel %vm4331_vm1, %v4199_v7, %v4459_v12 }
 0x203   :  { %v5627_v18 = vpack.c.bf16 %v4587_v17, %v4586_v9 }
 0x204   :  { %5162 = vst [vmem:[#allocation7 + $0x1f0] sm:$0xff] %v5626_v15 }
 0x205   :  { %5163 = vst [vmem:[#allocation7 + $0x1f8] sm:$0xff] %v5627_v18 }
 0x206   :  { %5690 = shalt.err (!%p5687_p6)
}
 0x207   :  { %s5691_s10 = scalar_lea.hbm %s6022_s2, 8192 }
 0x208   :  { %p5692_p7 = scmp.ne.s32.totalorder %s6022_s2, %s5691_s10  ;;  %p5695_p8 = scmp.lt.u32.totalorder %s5691_s10, %s6022_s2 }
 0x20a   :  { %p5697_p9 = pnand %p5695_p8, %p5692_p7 }
 0x20c   :  { %5700 = shalt.err (!%p5697_p9)
}
 0x20d   :  { %5173 = dma.vmem_to_hbm [thread:$0]  %s5171_s6, 8192, %s6022_s2, [#allocation4]  }
 0x20e   :  { %5705 = dma.done.wait [#allocation4], 8192  }
 0x20f   :  { %5706 = vsyncadd [#allocation4], 4294959104 }
 0x210   :  { %5177 = vsyncpa [#allocation3], 1 }
 0x211   :  { %5178 = vsyncpa [#allocation6], 1 }
 0x212   :  { %5179 = vsyncpa [#allocation4], 1 }

</bundles_post_ra>
